<compile_context>
chip_gen: v6e
topology: v6e:2x2x1
jax: 0.10.0
libtpu: 0.0.40
codegen_flags: <defaults>
</compile_context>

<pallas_src>
import functools

import jax
import jax.numpy as jnp
from jax import lax
from jax.experimental import pallas as pl
from jax.experimental.pallas import tpu as pltpu


# ----------------------------------------------------------------------------
# Fused kernel: [pad -> 3x3 conv (BN scale folded) -> +shift -> ReLU
#                -> ConvTranspose2d(k=2, s=2)]  on one (batch, row-tile) block.
# NHWC layout: channel is the lane dim.
# ----------------------------------------------------------------------------
def _masked_row(row, keep):
    # NaN-safe zeroing of a clamped halo row: broadcast an f32 0/1 flag and
    # select on it (avoids Inf*0 -> NaN and scalar-bool broadcasts).
    flag = jnp.full(row.shape, keep.astype(jnp.float32))
    return jnp.where(flag > 0.5, row, 0.0)


def _fused_conv_convt_kernel(x_cur_ref, x_top_ref, x_bot_ref,
                             w1_ref, shift_ref, w2_ref, b2_ref, o_ref):
    # x_cur_ref : (1, TH, W, Cin)     current input row tile
    # x_top_ref : (1, 1, W, Cin)      input row just above the tile (clamped)
    # x_bot_ref : (1, 1, W, Cin)      input row just below the tile (clamped)
    # w1_ref    : (9, Cin, Cmid)      3x3 conv weight * BN scale, [kh*3+kw, cin, o]
    # shift_ref : (1, Cmid)           folded BatchNorm shift (f32)
    # w2_ref    : (Cmid, 4*Cout)      transposed-conv weight packed as (i, j, cout)
    # b2_ref    : (1, 4*Cout)         transposed-conv bias tiled over (i, j) (f32)
    # o_ref     : (1, TH, 2, W, 2*Cout)  -> reshapes (metadata-only) to NHWC
    t = pl.program_id(1)
    nt = pl.num_programs(1)
    _, TH, W, Cin = x_cur_ref.shape
    Cmid = w1_ref.shape[-1]
    C4 = w2_ref.shape[-1]                      # 4 * Cout
    C2 = C4 // 2                               # 2 * Cout
    cdt = w1_ref.dtype                         # bf16 compute dtype

    # ---- stage 0: row-extended tile as a value (no padded VMEM scratch) ----
    top = _masked_row(x_top_ref[0], t > 0)          # first tile: top halo is zeros
    bot = _masked_row(x_bot_ref[0], t < nt - 1)     # last tile: bottom halo is zeros
    xe = jnp.concatenate([top, x_cur_ref[0], bot], axis=0).astype(cdt)  # (TH+2, W, Cin)

    # Horizontal (kw) shifts with zero borders; vertical (kh) shifts are row slices.
    zcol = jnp.zeros((TH + 2, 1, Cin), cdt)
    xe_by_kw = (
        jnp.concatenate([zcol, xe[:, :W - 1, :]], axis=1),   # kw=0 -> x[:, w-1]
        xe,                                                   # kw=1 -> x[:, w]
        jnp.concatenate([xe[:, 1:, :], zcol], axis=1),        # kw=2 -> x[:, w+1]
    )

    # ---- stage 1: 3x3 conv as 9 accumulating MXU dots (no im2col buffer) ----
    acc = jnp.zeros((TH * W, Cmid), jnp.float32)
    for kh in range(3):                       # static unroll: 9 dots, K=Cin each
        for kw in range(3):
            slab = xe_by_kw[kw][kh:kh + TH].reshape(TH * W, Cin)
            acc = acc + jnp.dot(slab, w1_ref[kh * 3 + kw],
                                preferred_element_type=jnp.float32)
    h = jnp.maximum(acc + shift_ref[...], 0.0).astype(cdt)   # BN shift + ReLU

    # ---- stage 2: ConvTranspose2d k=2, s=2 as ONE dot with N = 4*Cout ----
    # out[2h+i, 2w+j, c] = sum_cin h[h, w, cin] * W2[cin, (i, j, c)] + b[c]
    m = jnp.dot(h, w2_ref[...], preferred_element_type=jnp.float32) + b2_ref[...]
    m = m.astype(o_ref.dtype)                                 # (TH*W, 4*Cout)
    o_ref[0, :, 0, :, :] = m[:, :C2].reshape(TH, W, C2)       # output rows 2h
    o_ref[0, :, 1, :, :] = m[:, C2:].reshape(TH, W, C2)       # output rows 2h+1


# ----------------------------------------------------------------------------
# Wrapper
# ----------------------------------------------------------------------------
def _vmem_limit_bytes(TH, W, Cin, Cmid, Cout, x_bytes, c_bytes, o_bytes):
    """Rough per-step VMEM estimate * 2 margin, floored at the 32 MiB default and
    capped at 64 MiB so the explicit setting stays valid on v7x's smaller VMEM."""
    C2, C4 = 2 * Cout, 4 * Cout
    inp = 2 * (TH + 4) * W * Cin * x_bytes                 # double-buffered tile + halos
    outp = 2 * TH * 2 * W * C2 * o_bytes                   # double-buffered output block
    wgts = 2 * (9 * Cin * Cmid + Cmid * C4) * c_bytes + 2 * (Cmid + C4) * 4
    work = (4 * (TH + 2) * W * Cin + TH * W * Cin) * c_bytes      # xe + shifts + slab
    work += TH * W * (Cmid * (4 + c_bytes) + C4 * 4)              # acc f32 + h + m f32
    est = inp + outp + wgts + work
    return int(min(max(2 * est, 32 << 20), 64 << 20))


def conv_transpose_fused(x_nhwc, params, *, row_block=16, out_dtype=None):
    """Fused forward on NHWC input; returns NHWC output (N, 2H, 2W, Cout)."""
    N, H, W, Cin = x_nhwc.shape
    w1, shift = params["conv_w"], params["bn_shift"]
    w2, b2 = params["ct_w"], params["ct_b"]
    Cmid = w1.shape[-1]
    C4 = w2.shape[-1]
    C2 = C4 // 2
    Cout = C4 // 4
    assert w1.shape == (9, Cin, Cmid)
    assert w2.shape == (Cmid, C4)
    out_dtype = w2.dtype if out_dtype is None else out_dtype

    # Row tiling: TH in [1, row_block]; pad H up to a multiple of TH so awkward H
    # never degrades to tiny tiles (padded rows are zero and sliced off below).
    TH = min(row_block, H)
    Ht = pl.cdiv(H, TH)
    Hp = Ht * TH
    if Hp != H:
        x_nhwc = jnp.pad(x_nhwc, ((0, 0), (0, Hp - H), (0, 0), (0, 0)))

    # NOTE: the weight operands (w1/shift/w2/b2) are grid-invariant; single-buffering
    # them (pl.Buffered(1)) would shave a little VMEM but is left at the default.
    out5 = pl.pallas_call(
        _fused_conv_convt_kernel,
        out_shape=jax.ShapeDtypeStruct((N, Hp, 2, W, C2), out_dtype),
        grid=(N, Ht),
        in_specs=[
            pl.BlockSpec((1, TH, W, Cin), lambda n, t: (n, t, 0, 0)),
            # one-row halos (H-block size 1 -> block index == row index), clamped
            pl.BlockSpec((1, 1, W, Cin),
                         lambda n, t: (n, jnp.maximum(t * TH - 1, 0), 0, 0)),
            pl.BlockSpec((1, 1, W, Cin),
                         lambda n, t: (n, jnp.minimum(t * TH + TH, Hp - 1), 0, 0)),
            # grid-invariant weights / affine terms
            pl.BlockSpec((9, Cin, Cmid), lambda n, t: (0, 0, 0)),
            pl.BlockSpec((1, Cmid), lambda n, t: (0, 0)),
            pl.BlockSpec((Cmid, C4), lambda n, t: (0, 0)),
            pl.BlockSpec((1, C4), lambda n, t: (0, 0)),
        ],
        out_specs=pl.BlockSpec((1, TH, 2, W, C2), lambda n, t: (n, t, 0, 0, 0)),
        compiler_params=pltpu.CompilerParams(
            dimension_semantics=("parallel", "parallel"),
            vmem_limit_bytes=_vmem_limit_bytes(
                TH, W, Cin, Cmid, Cout,
                x_nhwc.dtype.itemsize, w1.dtype.itemsize,
                jnp.dtype(out_dtype).itemsize)),
    )(x_nhwc, x_nhwc, x_nhwc, w1, shift, w2, b2)

    if Hp != H:
        out5 = out5[:, :H]
    # Metadata-only reshape: (N, H, 2, W, 2*Cout) is bit-identical to NHWC output.
    return out5.reshape(N, 2 * H, 2 * W, Cout)


# ----------------------------------------------------------------------------
# Parameter repacking (PyTorch layouts -> kernel layouts), bf16 compute default
# ----------------------------------------------------------------------------
def prepare_params(conv_w_pt, bn_scale, bn_shift, ct_w_pt, ct_b,
                   compute_dtype=jnp.bfloat16):
    # conv_w_pt : (Cmid, Cin, 3, 3)   nn.Conv2d weight (O, I, kh, kw)
    # ct_w_pt   : (Cmid, Cout, 2, 2)  nn.ConvTranspose2d weight (I, O, kh, kw)
    Cmid, Cin = conv_w_pt.shape[0], conv_w_pt.shape[1]
    Cout = ct_w_pt.shape[1]
    # Fold the BN scale into the conv weight's output channels (conv is linear).
    w1 = jnp.transpose(conv_w_pt, (2, 3, 1, 0)) * bn_scale.reshape(1, 1, 1, Cmid)
    w1 = w1.reshape(9, Cin, Cmid)
    # Pack ConvTranspose weight so ONE dot yields all four (i, j) output taps:
    #   w2[cin, i*2*Cout + j*Cout + c] = W_ct[cin, c, i, j]
    w2 = jnp.transpose(ct_w_pt, (0, 2, 3, 1)).reshape(Cmid, 4 * Cout)
    return {
        "conv_w": w1.astype(compute_dtype),
        "bn_shift": bn_shift.reshape(1, Cmid).astype(jnp.float32),
        "ct_w": w2.astype(compute_dtype),
        "ct_b": jnp.tile(ct_b, 4).reshape(1, 4 * Cout).astype(jnp.float32),
    }


# ----------------------------------------------------------------------------
# Module wrapper — NHWC end-to-end by default (no NCHW round-trip transposes)
# ----------------------------------------------------------------------------
def conv_transpose_module(x, params, *, row_block=16, channels_last=True,
                          out_dtype=None):
    if channels_last:
        return conv_transpose_fused(x, params, row_block=row_block,
                                    out_dtype=out_dtype)
    # NCHW parity path (PyTorch layout): both transposes are full HBM passes and
    # can cost more than the fused kernel itself — use only if the consumer needs NCHW.
    x_nhwc = jnp.transpose(x, (0, 2, 3, 1))
    y = conv_transpose_fused(x_nhwc, params, row_block=row_block,
                             out_dtype=out_dtype)
    return jnp.transpose(y, (0, 3, 1, 2))


# ----------------------------------------------------------------------------
# Pure-JAX reference (same math, XLA ops, f32 HIGHEST precision) for sanity check
# ----------------------------------------------------------------------------
def reference(x_nchw, conv_w_pt, bn_scale, bn_shift, ct_w_pt, ct_b):
    y = lax.conv_general_dilated(
        x_nchw, conv_w_pt, window_strides=(1, 1), padding=((1, 1), (1, 1)),
        dimension_numbers=("NCHW", "OIHW", "NCHW"),
        precision=lax.Precision.HIGHEST)
    y = y * bn_scale[None, :, None, None] + bn_shift[None, :, None, None]
    y = jnp.maximum(y, 0.0)
    # transposed conv, k=2, s=2, p=0: out[2h+i, 2w+j] = sum_c y[h,w,c] W[c,d,i,j]
    m = jnp.einsum("nchw,cdij->ndhiwj", y, ct_w_pt,
                   precision=lax.Precision.HIGHEST)
    N, D, H, _, W, _ = m.shape
    m = m.reshape(N, D, 2 * H, 2 * W) + ct_b[None, :, None, None]
    return m


if __name__ == "__main__":
    key = jax.random.PRNGKey(0)
    k1, k2, k3, k4, k5, k6 = jax.random.split(key, 6)

    N, Cin, Cout, H, W = 2, 4, 8, 16, 16

    x_nchw = jax.random.normal(k1, (N, Cin, H, W), jnp.float32)

    # Deterministic synthetic parameters in PyTorch layouts.
    conv_w_pt = 0.1 * jax.random.normal(k2, (Cin, Cin, 3, 3), jnp.float32)   # (O,I,kh,kw)
    bn_scale = 1.0 + 0.1 * jax.random.normal(k3, (Cin,), jnp.float32)        # folded BN
    bn_shift = 0.1 * jax.random.normal(k4, (Cin,), jnp.float32)
    ct_w_pt = 0.1 * jax.random.normal(k5, (Cin, Cout, 2, 2), jnp.float32)    # (I,O,kh,kw)
    ct_b = 0.1 * jax.random.normal(k6, (Cout,), jnp.float32)

    params = prepare_params(conv_w_pt, bn_scale, bn_shift, ct_w_pt, ct_b)    # bf16 compute

    # NHWC end-to-end; row_block=8 -> TH=8, grid=(2, 2): exercises the halo path
    # and gives >= 2 balanced parallel grid points for multi-TensorCore chips.
    x_nhwc = jnp.transpose(x_nchw, (0, 2, 3, 1))
    run = jax.jit(functools.partial(conv_transpose_module, row_block=8))
    out = jax.block_until_ready(run(x_nhwc, params))

    ref_nhwc = jnp.transpose(
        reference(x_nchw, conv_w_pt, bn_scale, bn_shift, ct_w_pt, ct_b),
        (0, 2, 3, 1))
    assert out.shape == (N, 2 * H, 2 * W, Cout), out.shape
    err = float(jnp.max(jnp.abs(out.astype(jnp.float32) - ref_nhwc)))
    scale = float(jnp.max(jnp.abs(ref_nhwc)))
    # bf16 MXU compute + bf16 output -> relative tolerance vs. f32 reference.
    assert err <= 5e-2 * scale + 1e-3, f"max abs err {err} (ref scale {scale})"

    print("KERNEL_OK")
</pallas_src>

<mosaic_0001>
module attributes {stable_mosaic.version = 11 : i64} {
  func.func @_fused_conv_convt_kernel(%arg0: i32, %arg1: i32, %arg2: memref<1x8x16x4xf32, #tpu.memory_space<vmem>>, %arg3: memref<1x1x16x4xf32, #tpu.memory_space<vmem>>, %arg4: memref<1x1x16x4xf32, #tpu.memory_space<vmem>>, %arg5: memref<9x4x4xbf16, #tpu.memory_space<vmem>>, %arg6: memref<1x4xf32, #tpu.memory_space<vmem>>, %arg7: memref<4x32xbf16, #tpu.memory_space<vmem>>, %arg8: memref<1x32xf32, #tpu.memory_space<vmem>>, %arg9: memref<1x8x2x16x16xbf16, #tpu.memory_space<vmem>>) attributes {dimension_semantics = [#tpu.dimension_semantics<parallel>, #tpu.dimension_semantics<parallel>], iteration_bounds = array<i64: 2, 2>, scalar_prefetch = 0 : i64, scratch_operands = 0 : i64, tpu.core_type = #tpu.core_type<tc>, window_params = [{transform_indices = @transform_0, window_bounds = array<i64: 1, 8, 16, 4>}, {transform_indices = @transform_1, window_bounds = array<i64: 1, 1, 16, 4>}, {transform_indices = @transform_2, window_bounds = array<i64: 1, 1, 16, 4>}, {pipeline_mode = #tpu.pipeline_mode<synchronous>, transform_indices = @transform_3, window_bounds = array<i64: 9, 4, 4>}, {pipeline_mode = #tpu.pipeline_mode<synchronous>, transform_indices = @transform_4, window_bounds = array<i64: 1, 4>}, {pipeline_mode = #tpu.pipeline_mode<synchronous>, transform_indices = @transform_5, window_bounds = array<i64: 4, 32>}, {pipeline_mode = #tpu.pipeline_mode<synchronous>, transform_indices = @transform_6, window_bounds = array<i64: 1, 32>}, {transform_indices = @transform_7, window_bounds = array<i64: 1, 8, 2, 16, 16>}]} {
    %c0 = arith.constant 0 : index
    %c0_0 = arith.constant 0 : index
    %c0_1 = arith.constant 0 : index
    %c0_2 = arith.constant 0 : index
    %0 = vector.load %arg3[%c0, %c0_0, %c0_1, %c0_2] : memref<1x1x16x4xf32, #tpu.memory_space<vmem>>, vector<1x1x16x4xf32>
    %1 = vector.shape_cast %0 : vector<1x1x16x4xf32> to vector<1x16x4xf32>
    %c0_i32 = arith.constant 0 : i32
    %2 = arith.cmpi sgt, %arg1, %c0_i32 : i32
    %3 = arith.extui %2 : i1 to i32
    %4 = arith.sitofp %3 : i32 to f32
    %5 = vector.broadcast %4 : f32 to vector<1x16x4xf32>
    %cst = arith.constant 5.000000e-01 : f32
    %6 = vector.broadcast %cst : f32 to vector<1x16x4xf32>
    %7 = arith.cmpf ogt, %5, %6 : vector<1x16x4xf32>
    %cst_3 = arith.constant 0.000000e+00 : f32
    %8 = vector.broadcast %cst_3 : f32 to vector<1x16x4xf32>
    %9 = arith.select %7, %1, %8 : vector<1x16x4xi1>, vector<1x16x4xf32>
    %c0_4 = arith.constant 0 : index
    %c0_5 = arith.constant 0 : index
    %c0_6 = arith.constant 0 : index
    %c0_7 = arith.constant 0 : index
    %10 = vector.load %arg4[%c0_4, %c0_5, %c0_6, %c0_7] : memref<1x1x16x4xf32, #tpu.memory_space<vmem>>, vector<1x1x16x4xf32>
    %11 = vector.shape_cast %10 : vector<1x1x16x4xf32> to vector<1x16x4xf32>
    %c1_i32 = arith.constant 1 : i32
    %12 = arith.cmpi slt, %arg1, %c1_i32 : i32
    %13 = arith.extui %12 : i1 to i32
    %14 = arith.sitofp %13 : i32 to f32
    %15 = vector.broadcast %14 : f32 to vector<1x16x4xf32>
    %cst_8 = arith.constant 5.000000e-01 : f32
    %16 = vector.broadcast %cst_8 : f32 to vector<1x16x4xf32>
    %17 = arith.cmpf ogt, %15, %16 : vector<1x16x4xf32>
    %cst_9 = arith.constant 0.000000e+00 : f32
    %18 = vector.broadcast %cst_9 : f32 to vector<1x16x4xf32>
    %19 = arith.select %17, %11, %18 : vector<1x16x4xi1>, vector<1x16x4xf32>
    %c0_10 = arith.constant 0 : index
    %c0_11 = arith.constant 0 : index
    %c0_12 = arith.constant 0 : index
    %c0_13 = arith.constant 0 : index
    %20 = vector.load %arg2[%c0_10, %c0_11, %c0_12, %c0_13] : memref<1x8x16x4xf32, #tpu.memory_space<vmem>>, vector<1x8x16x4xf32>
    %21 = vector.shape_cast %20 : vector<1x8x16x4xf32> to vector<8x16x4xf32>
    %22 = tpu.concatenate %9, %21, %19 in 0 : vector<1x16x4xf32>, vector<8x16x4xf32>, vector<1x16x4xf32> -> vector<10x16x4xf32>
    %23 = arith.truncf %22 : vector<10x16x4xf32> to vector<10x16x4xbf16>
    %cst_14 = arith.constant 0.000000e+00 : bf16
    %24 = vector.broadcast %cst_14 : bf16 to vector<10x1x4xbf16>
    %25 = vector.extract_strided_slice %23 {offsets = [0, 0, 0], sizes = [10, 15, 4], strides = [1, 1, 1]} : vector<10x16x4xbf16> to vector<10x15x4xbf16>
    %26 = tpu.concatenate %24, %25 in 1 : vector<10x1x4xbf16>, vector<10x15x4xbf16> -> vector<10x16x4xbf16>
    %27 = vector.extract_strided_slice %23 {offsets = [0, 1, 0], sizes = [10, 15, 4], strides = [1, 1, 1]} : vector<10x16x4xbf16> to vector<10x15x4xbf16>
    %28 = tpu.concatenate %27, %24 in 1 : vector<10x15x4xbf16>, vector<10x1x4xbf16> -> vector<10x16x4xbf16>
    %cst_15 = arith.constant 0.000000e+00 : f32
    %29 = vector.broadcast %cst_15 : f32 to vector<128x4xf32>
    %30 = vector.extract_strided_slice %26 {offsets = [0, 0, 0], sizes = [8, 16, 4], strides = [1, 1, 1]} : vector<10x16x4xbf16> to vector<8x16x4xbf16>
    %31 = vector.shape_cast %30 : vector<8x16x4xbf16> to vector<128x4xbf16>
    %c0_16 = arith.constant 0 : index
    %c0_17 = arith.constant 0 : index
    %c0_18 = arith.constant 0 : index
    %32 = vector.load %arg5[%c0_16, %c0_17, %c0_18] : memref<9x4x4xbf16, #tpu.memory_space<vmem>>, vector<1x4x4xbf16>
    %33 = vector.shape_cast %32 : vector<1x4x4xbf16> to vector<4x4xbf16>
    %cst_19 = arith.constant dense<0.000000e+00> : vector<128x4xf32>
    %34 = tpu.matmul %31, %33, %cst_19 {dimension_numbers = #tpu.dot_dimension_numbers<[1], [0], [0], [1], [0, 0, 1, 1], [], []>} : vector<128x4xbf16>, vector<4x4xbf16>, vector<128x4xf32> -> vector<128x4xf32>
    %35 = arith.addf %29, %34 : vector<128x4xf32>
    %36 = vector.extract_strided_slice %23 {offsets = [0, 0, 0], sizes = [8, 16, 4], strides = [1, 1, 1]} : vector<10x16x4xbf16> to vector<8x16x4xbf16>
    %37 = vector.shape_cast %36 : vector<8x16x4xbf16> to vector<128x4xbf16>
    %c1 = arith.constant 1 : index
    %c0_20 = arith.constant 0 : index
    %c0_21 = arith.constant 0 : index
    %38 = vector.load %arg5[%c1, %c0_20, %c0_21] : memref<9x4x4xbf16, #tpu.memory_space<vmem>>, vector<1x4x4xbf16>
    %39 = vector.shape_cast %38 : vector<1x4x4xbf16> to vector<4x4xbf16>
    %cst_22 = arith.constant dense<0.000000e+00> : vector<128x4xf32>
    %40 = tpu.matmul %37, %39, %cst_22 {dimension_numbers = #tpu.dot_dimension_numbers<[1], [0], [0], [1], [0, 0, 1, 1], [], []>} : vector<128x4xbf16>, vector<4x4xbf16>, vector<128x4xf32> -> vector<128x4xf32>
    %41 = arith.addf %35, %40 : vector<128x4xf32>
    %42 = vector.extract_strided_slice %28 {offsets = [0, 0, 0], sizes = [8, 16, 4], strides = [1, 1, 1]} : vector<10x16x4xbf16> to vector<8x16x4xbf16>
    %43 = vector.shape_cast %42 : vector<8x16x4xbf16> to vector<128x4xbf16>
    %c2 = arith.constant 2 : index
    %c0_23 = arith.constant 0 : index
    %c0_24 = arith.constant 0 : index
    %44 = vector.load %arg5[%c2, %c0_23, %c0_24] : memref<9x4x4xbf16, #tpu.memory_space<vmem>>, vector<1x4x4xbf16>
    %45 = vector.shape_cast %44 : vector<1x4x4xbf16> to vector<4x4xbf16>
    %cst_25 = arith.constant dense<0.000000e+00> : vector<128x4xf32>
    %46 = tpu.matmul %43, %45, %cst_25 {dimension_numbers = #tpu.dot_dimension_numbers<[1], [0], [0], [1], [0, 0, 1, 1], [], []>} : vector<128x4xbf16>, vector<4x4xbf16>, vector<128x4xf32> -> vector<128x4xf32>
    %47 = arith.addf %41, %46 : vector<128x4xf32>
    %48 = vector.extract_strided_slice %26 {offsets = [1, 0, 0], sizes = [8, 16, 4], strides = [1, 1, 1]} : vector<10x16x4xbf16> to vector<8x16x4xbf16>
    %49 = vector.shape_cast %48 : vector<8x16x4xbf16> to vector<128x4xbf16>
    %c3 = arith.constant 3 : index
    %c0_26 = arith.constant 0 : index
    %c0_27 = arith.constant 0 : index
    %50 = vector.load %arg5[%c3, %c0_26, %c0_27] : memref<9x4x4xbf16, #tpu.memory_space<vmem>>, vector<1x4x4xbf16>
    %51 = vector.shape_cast %50 : vector<1x4x4xbf16> to vector<4x4xbf16>
    %cst_28 = arith.constant dense<0.000000e+00> : vector<128x4xf32>
    %52 = tpu.matmul %49, %51, %cst_28 {dimension_numbers = #tpu.dot_dimension_numbers<[1], [0], [0], [1], [0, 0, 1, 1], [], []>} : vector<128x4xbf16>, vector<4x4xbf16>, vector<128x4xf32> -> vector<128x4xf32>
    %53 = arith.addf %47, %52 : vector<128x4xf32>
    %54 = vector.extract_strided_slice %23 {offsets = [1, 0, 0], sizes = [8, 16, 4], strides = [1, 1, 1]} : vector<10x16x4xbf16> to vector<8x16x4xbf16>
    %55 = vector.shape_cast %54 : vector<8x16x4xbf16> to vector<128x4xbf16>
    %c4 = arith.constant 4 : index
    %c0_29 = arith.constant 0 : index
    %c0_30 = arith.constant 0 : index
    %56 = vector.load %arg5[%c4, %c0_29, %c0_30] : memref<9x4x4xbf16, #tpu.memory_space<vmem>>, vector<1x4x4xbf16>
    %57 = vector.shape_cast %56 : vector<1x4x4xbf16> to vector<4x4xbf16>
    %cst_31 = arith.constant dense<0.000000e+00> : vector<128x4xf32>
    %58 = tpu.matmul %55, %57, %cst_31 {dimension_numbers = #tpu.dot_dimension_numbers<[1], [0], [0], [1], [0, 0, 1, 1], [], []>} : vector<128x4xbf16>, vector<4x4xbf16>, vector<128x4xf32> -> vector<128x4xf32>
    %59 = arith.addf %53, %58 : vector<128x4xf32>
    %60 = vector.extract_strided_slice %28 {offsets = [1, 0, 0], sizes = [8, 16, 4], strides = [1, 1, 1]} : vector<10x16x4xbf16> to vector<8x16x4xbf16>
    %61 = vector.shape_cast %60 : vector<8x16x4xbf16> to vector<128x4xbf16>
    %c5 = arith.constant 5 : index
    %c0_32 = arith.constant 0 : index
    %c0_33 = arith.constant 0 : index
    %62 = vector.load %arg5[%c5, %c0_32, %c0_33] : memref<9x4x4xbf16, #tpu.memory_space<vmem>>, vector<1x4x4xbf16>
    %63 = vector.shape_cast %62 : vector<1x4x4xbf16> to vector<4x4xbf16>
    %cst_34 = arith.constant dense<0.000000e+00> : vector<128x4xf32>
    %64 = tpu.matmul %61, %63, %cst_34 {dimension_numbers = #tpu.dot_dimension_numbers<[1], [0], [0], [1], [0, 0, 1, 1], [], []>} : vector<128x4xbf16>, vector<4x4xbf16>, vector<128x4xf32> -> vector<128x4xf32>
    %65 = arith.addf %59, %64 : vector<128x4xf32>
    %66 = vector.extract_strided_slice %26 {offsets = [2, 0, 0], sizes = [8, 16, 4], strides = [1, 1, 1]} : vector<10x16x4xbf16> to vector<8x16x4xbf16>
    %67 = vector.shape_cast %66 : vector<8x16x4xbf16> to vector<128x4xbf16>
    %c6 = arith.constant 6 : index
    %c0_35 = arith.constant 0 : index
    %c0_36 = arith.constant 0 : index
    %68 = vector.load %arg5[%c6, %c0_35, %c0_36] : memref<9x4x4xbf16, #tpu.memory_space<vmem>>, vector<1x4x4xbf16>
    %69 = vector.shape_cast %68 : vector<1x4x4xbf16> to vector<4x4xbf16>
    %cst_37 = arith.constant dense<0.000000e+00> : vector<128x4xf32>
    %70 = tpu.matmul %67, %69, %cst_37 {dimension_numbers = #tpu.dot_dimension_numbers<[1], [0], [0], [1], [0, 0, 1, 1], [], []>} : vector<128x4xbf16>, vector<4x4xbf16>, vector<128x4xf32> -> vector<128x4xf32>
    %71 = arith.addf %65, %70 : vector<128x4xf32>
    %72 = vector.extract_strided_slice %23 {offsets = [2, 0, 0], sizes = [8, 16, 4], strides = [1, 1, 1]} : vector<10x16x4xbf16> to vector<8x16x4xbf16>
    %73 = vector.shape_cast %72 : vector<8x16x4xbf16> to vector<128x4xbf16>
    %c7 = arith.constant 7 : index
    %c0_38 = arith.constant 0 : index
    %c0_39 = arith.constant 0 : index
    %74 = vector.load %arg5[%c7, %c0_38, %c0_39] : memref<9x4x4xbf16, #tpu.memory_space<vmem>>, vector<1x4x4xbf16>
    %75 = vector.shape_cast %74 : vector<1x4x4xbf16> to vector<4x4xbf16>
    %cst_40 = arith.constant dense<0.000000e+00> : vector<128x4xf32>
    %76 = tpu.matmul %73, %75, %cst_40 {dimension_numbers = #tpu.dot_dimension_numbers<[1], [0], [0], [1], [0, 0, 1, 1], [], []>} : vector<128x4xbf16>, vector<4x4xbf16>, vector<128x4xf32> -> vector<128x4xf32>
    %77 = arith.addf %71, %76 : vector<128x4xf32>
    %78 = vector.extract_strided_slice %28 {offsets = [2, 0, 0], sizes = [8, 16, 4], strides = [1, 1, 1]} : vector<10x16x4xbf16> to vector<8x16x4xbf16>
    %79 = vector.shape_cast %78 : vector<8x16x4xbf16> to vector<128x4xbf16>
    %c8 = arith.constant 8 : index
    %c0_41 = arith.constant 0 : index
    %c0_42 = arith.constant 0 : index
    %80 = vector.load %arg5[%c8, %c0_41, %c0_42] : memref<9x4x4xbf16, #tpu.memory_space<vmem>>, vector<1x4x4xbf16>
    %81 = vector.shape_cast %80 : vector<1x4x4xbf16> to vector<4x4xbf16>
    %cst_43 = arith.constant dense<0.000000e+00> : vector<128x4xf32>
    %82 = tpu.matmul %79, %81, %cst_43 {dimension_numbers = #tpu.dot_dimension_numbers<[1], [0], [0], [1], [0, 0, 1, 1], [], []>} : vector<128x4xbf16>, vector<4x4xbf16>, vector<128x4xf32> -> vector<128x4xf32>
    %83 = arith.addf %77, %82 : vector<128x4xf32>
    %c0_44 = arith.constant 0 : index
    %c0_45 = arith.constant 0 : index
    %84 = vector.load %arg6[%c0_44, %c0_45] : memref<1x4xf32, #tpu.memory_space<vmem>>, vector<1x4xf32>
    %85 = vector.broadcast %84 : vector<1x4xf32> to vector<128x4xf32>
    %86 = arith.addf %83, %85 : vector<128x4xf32>
    %cst_46 = arith.constant 0.000000e+00 : f32
    %87 = vector.broadcast %cst_46 : f32 to vector<128x4xf32>
    %88 = arith.maximumf %86, %87 : vector<128x4xf32>
    %89 = arith.truncf %88 : vector<128x4xf32> to vector<128x4xbf16>
    %c0_47 = arith.constant 0 : index
    %c0_48 = arith.constant 0 : index
    %90 = vector.load %arg7[%c0_47, %c0_48] : memref<4x32xbf16, #tpu.memory_space<vmem>>, vector<4x32xbf16>
    %cst_49 = arith.constant dense<0.000000e+00> : vector<128x32xf32>
    %91 = tpu.matmul %89, %90, %cst_49 {dimension_numbers = #tpu.dot_dimension_numbers<[1], [0], [0], [1], [0, 0, 1, 1], [], []>} : vector<128x4xbf16>, vector<4x32xbf16>, vector<128x32xf32> -> vector<128x32xf32>
    %c0_50 = arith.constant 0 : index
    %c0_51 = arith.constant 0 : index
    %92 = vector.load %arg8[%c0_50, %c0_51] : memref<1x32xf32, #tpu.memory_space<vmem>>, vector<1x32xf32>
    %93 = vector.broadcast %92 : vector<1x32xf32> to vector<128x32xf32>
    %94 = arith.addf %91, %93 : vector<128x32xf32>
    %95 = arith.truncf %94 : vector<128x32xf32> to vector<128x32xbf16>
    %96 = vector.extract_strided_slice %95 {offsets = [0, 0], sizes = [128, 16], strides = [1, 1]} : vector<128x32xbf16> to vector<128x16xbf16>
    %97 = vector.shape_cast %96 : vector<128x16xbf16> to vector<8x16x16xbf16>
    %c0_52 = arith.constant 0 : index
    %c0_53 = arith.constant 0 : index
    %c0_54 = arith.constant 0 : index
    %c0_55 = arith.constant 0 : index
    %c0_56 = arith.constant 0 : index
    %98 = vector.load %arg9[%c0_52, %c0_53, %c0_54, %c0_55, %c0_56] : memref<1x8x2x16x16xbf16, #tpu.memory_space<vmem>>, vector<1x8x1x16x16xbf16>
    %99 = vector.shape_cast %98 : vector<1x8x1x16x16xbf16> to vector<8x16x16xbf16>
    %100 = vector.shape_cast %97 : vector<8x16x16xbf16> to vector<1x8x1x16x16xbf16>
    tpu.vector_store %arg9[%c0_52, %c0_53, %c0_54, %c0_55, %c0_56], %100 {strides = array<i32>} : memref<1x8x2x16x16xbf16, #tpu.memory_space<vmem>>, vector<1x8x1x16x16xbf16>,
    %101 = vector.extract_strided_slice %95 {offsets = [0, 16], sizes = [128, 16], strides = [1, 1]} : vector<128x32xbf16> to vector<128x16xbf16>
    %102 = vector.shape_cast %101 : vector<128x16xbf16> to vector<8x16x16xbf16>
    %c0_57 = arith.constant 0 : index
    %c0_58 = arith.constant 0 : index
    %c1_59 = arith.constant 1 : index
    %c0_60 = arith.constant 0 : index
    %c0_61 = arith.constant 0 : index
    %103 = vector.load %arg9[%c0_57, %c0_58, %c1_59, %c0_60, %c0_61] : memref<1x8x2x16x16xbf16, #tpu.memory_space<vmem>>, vector<1x8x1x16x16xbf16>
    %104 = vector.shape_cast %103 : vector<1x8x1x16x16xbf16> to vector<8x16x16xbf16>
    %105 = vector.shape_cast %102 : vector<8x16x16xbf16> to vector<1x8x1x16x16xbf16>
    tpu.vector_store %arg9[%c0_57, %c0_58, %c1_59, %c0_60, %c0_61], %105 {strides = array<i32>} : memref<1x8x2x16x16xbf16, #tpu.memory_space<vmem>>, vector<1x8x1x16x16xbf16>,
    return
  }
  func.func @transform_0(%arg0: i32, %arg1: i32) -> (i32, i32, i32, i32) {
    %c0_i32 = arith.constant 0 : i32
    %c0_i32_0 = arith.constant 0 : i32
    %c0_i32_1 = arith.constant 0 : i32
    return %arg0, %arg1, %c0_i32, %c0_i32_0 : i32, i32, i32, i32
  }
  func.func @transform_1(%arg0: i32, %arg1: i32) -> (i32, i32, i32, i32) {
    %c8_i32 = arith.constant 8 : i32
    %0 = arith.muli %arg1, %c8_i32 : i32
    %c1_i32 = arith.constant 1 : i32
    %1 = arith.subi %0, %c1_i32 : i32
    %c0_i32 = arith.constant 0 : i32
    %2 = arith.maxsi %1, %c0_i32 : i32
    %c0_i32_0 = arith.constant 0 : i32
    %c0_i32_1 = arith.constant 0 : i32
    %c0_i32_2 = arith.constant 0 : i32
    return %arg0, %2, %c0_i32_0, %c0_i32_1 : i32, i32, i32, i32
  }
  func.func @transform_2(%arg0: i32, %arg1: i32) -> (i32, i32, i32, i32) {
    %c8_i32 = arith.constant 8 : i32
    %0 = arith.muli %arg1, %c8_i32 : i32
    %c8_i32_0 = arith.constant 8 : i32
    %1 = arith.addi %0, %c8_i32_0 : i32
    %c15_i32 = arith.constant 15 : i32
    %2 = arith.minsi %1, %c15_i32 : i32
    %c0_i32 = arith.constant 0 : i32
    %c0_i32_1 = arith.constant 0 : i32
    %c0_i32_2 = arith.constant 0 : i32
    return %arg0, %2, %c0_i32, %c0_i32_1 : i32, i32, i32, i32
  }
  func.func @transform_3(%arg0: i32, %arg1: i32) -> (i32, i32, i32) {
    %c0_i32 = arith.constant 0 : i32
    %c0_i32_0 = arith.constant 0 : i32
    %c0_i32_1 = arith.constant 0 : i32
    %c0_i32_2 = arith.constant 0 : i32
    return %c0_i32, %c0_i32_0, %c0_i32_1 : i32, i32, i32
  }
  func.func @transform_4(%arg0: i32, %arg1: i32) -> (i32, i32) {
    %c0_i32 = arith.constant 0 : i32
    %c0_i32_0 = arith.constant 0 : i32
    %c0_i32_1 = arith.constant 0 : i32
    return %c0_i32, %c0_i32_0 : i32, i32
  }
  func.func @transform_5(%arg0: i32, %arg1: i32) -> (i32, i32) {
    %c0_i32 = arith.constant 0 : i32
    %c0_i32_0 = arith.constant 0 : i32
    %c0_i32_1 = arith.constant 0 : i32
    return %c0_i32, %c0_i32_0 : i32, i32
  }
  func.func @transform_6(%arg0: i32, %arg1: i32) -> (i32, i32) {
    %c0_i32 = arith.constant 0 : i32
    %c0_i32_0 = arith.constant 0 : i32
    %c0_i32_1 = arith.constant 0 : i32
    return %c0_i32, %c0_i32_0 : i32, i32
  }
  func.func @transform_7(%arg0: i32, %arg1: i32) -> (i32, i32, i32, i32, i32) {
    %c0_i32 = arith.constant 0 : i32
    %c0_i32_0 = arith.constant 0 : i32
    %c0_i32_1 = arith.constant 0 : i32
    %c0_i32_2 = arith.constant 0 : i32
    return %arg0, %arg1, %c0_i32, %c0_i32_0, %c0_i32_1 : i32, i32, i32, i32, i32
  }
}

</mosaic_0001>

<bundles_post_ra>
// kernel: conv_transpose_module.1
= control target key start
LH: loop header
LB: loop body
LE: loop exit
PB: predicated region body
PF: predicated region fallthrough
CT: control target
= control target key end

     0   :  { %s2797_s24 = smov 0   ;;  %s2799_s25 = smov 0   ;;  %s3605_s0 = inlined_call_operand.vmem [shape: f32[2,16,16,4], index: 0, kind: input, shape index: {}, may-alias: {0,1,2}]   ;;  %s3606_s1 = inlined_call_operand.vmem [shape: f32[2,16,16,4], index: 1, kind: input, shape index: {}, may-alias: {0,1,2}]   ;;  %s3607_s2 = inlined_call_operand.vmem [shape: f32[2,16,16,4], index: 2, kind: input, shape index: {}, may-alias: {0,1,2}]   ;;  %s3608_s3 = inlined_call_operand.vmem [shape: bf16[9,4,4], index: 3, kind: input, shape index: {}]   ;;  %s3609_s4 = inlined_call_operand.vmem [shape: f32[1,4], index: 4, kind: input, shape index: {}]   ;;  %s3610_s5 = inlined_call_operand.vmem [shape: bf16[4,32], index: 5, kind: input, shape index: {}]   ;;  %s3611_s6 = inlined_call_operand.vmem [shape: f32[1,32], index: 6, kind: input, shape index: {}]   ;;  %s3612_s7 = inlined_call_operand.vmem [shape: bf16[2,16,2,16,16], index: 7, kind: output, shape index: {}]  }
   0x1   :  { %s2801_s26 = smov 0   ;;  %s2803_s27 = smov 0  }
   0x2   :  { %s2805_s28 = smov 0  }
   0x3 LB: > { %s26_s29 = sadd.s32 1, %s2746_s26  ;;  %s29_s30 = sadd.s32 1, %s2750_s27  ;;  %s2754_s28 = sphi %s2805_s28, %s17_s28   ;;  %s2750_s27 = sphi %s2803_s27, %s3682_s27   ;;  %s2746_s26 = sphi %s2801_s26, %s3681_s26   ;;  %s2742_s25 = sphi %s2799_s25, %s3680_s25   ;;  %s2738_s24 = sphi %s2797_s24, %s3679_s24  }
   0x4   : > { %p27_p0 = scmp.ge.s32.totalorder %s26_s29, 2  ;;  %p2215_p1 = scmp.ge.s32.totalorder %s2754_s28, 1 }
   0x5   : > { %p323_p2 = scmp.lt.s32.totalorder %s2754_s28, 5 }
   0x6   : > { %s3684_s29 = smov (%p27_p0, %s26_s29), 0  ;;  %s3686_s30 = smov (!%p27_p0, %s29_s30), %s2750_s27 }
   0x7   : > { %p324_p3 = pnand %p2215_p1, %p323_p2  ;;  %p31_p4 = scmp.ge.s32.totalorder %s3686_s30, 2 }
   0x9   : > { %s3688_s30 = smov (%p31_p4, %s3686_s30), 0  ;;  %327 = sbr.rel (%p324_p3) target bundleno = 725 (0x2d5), region = 48 }
   0xe   : > { %v2241_v0 = vld [vmem:[%s3608_s3 + $0x2] sm:$0x3]  ;;  %vm648_vm0 = vcmask 1041408   ;;  %s2216_s10 = sshll.u32 %s2738_s24, 3  ;;  %p392_p5 = scmp.lt.s32.totalorder %s2742_s25, 1  ;;  %vm631_vm1 = vcmask 31744  }
   0xf   : > { %2653 = vmatprep.subr.msk.bf16.mxu0 %vm648_vm0, %v2241_v0  ;;  %v650_v1 = vsel %vm648_vm0, %v2241_v0, 0  ;;  %p394_p6 = scmp.lt.s32.totalorder %s2216_s10, 15  ;;  %s2221_s11 = sadd.s32 4294967295, %s2216_s10  ;;  %v2838_v2 = vld [vmem:[%s3608_s3 + $0x4] sm:$0x3]  ;;  %vm572_vm2 = vcmask 1040384  }
  0x10   : > { %2474 = vmatpush3.bf16.msra.mxu0 %v650_v1  ;;  %s3690_s25 = smov (!%p392_p5, %s2742_s25), 1  ;;  %v628_v3 = vld [vmem:[%s3608_s3] sm:$0x3]  ;;  %v2852_v5 = vld [vmem:[%s3608_s3 + $0x6] sm:$0x3]  ;;  %p404_p7 = scmp.gt.s32.totalorder %s2221_s11, 0 }
  0x11   : > { %s395_s16 = scalar_select %p394_p6, %s2216_s10, 15  ;;  %2655 = vmatprep.subr.msk.bf16.mxu0 %vm648_vm0, %v2838_v2  ;;  %2654 = vmatprep.subr.msk.bf16.mxu1 %vm648_vm0, %v628_v3  ;;  %v774_v4 = vsel %vm648_vm0, %v628_v3, 0  ;;  %v900_v28 = vsel %vm648_vm0, %v2838_v2, 0  ;;  %vm573_vm3 = vsmask.f32 256  ;;  %v1021_v58 = vsel %vm648_vm0, %v2852_v5, 0 }
  0x12   : > { %s2218_s19 = sshll.u32 %s3690_s25, 5  ;;  %2492 = vmatpush3.bf16.msra.mxu1 %v774_v4  ;;  %p2222_p8 = scmp.lt.s32.totalorder %s2221_s11, 15  ;;  %v2908_v32 = vld [vmem:[%s3608_s3 + $0x8] sm:$0x3]  ;;  %vm2924_vm4 = vmand %vm572_vm2, %vm573_vm3  ;;  %v2968_v59 = vld [vmem:[%s3608_s3 + $0xa] sm:$0x3] }
  0x13   : > { %s2217_s20 = sshll.u32 %s395_s16, 1  ;;  %2656 = vmatprep.subr.msk.bf16.mxu1 %vm648_vm0, %v2852_v5  ;;  %s420_s22 = sadd.s32 8, %s2216_s10  ;;  %vm615_vm5 = vcmask 1047552   ;;  %vm616_vm6 = vsmask.f32 7424  ;;  %vm1982_vm8 = vcmask 125952  }
  0x14   : > { %s398_s21 = sadd.s32 %s2218_s19, %s2217_s20  ;;  %p421_p9 = scmp.lt.s32.totalorder %s420_s22, 15  ;;  %vm3016_vm7 = vmand %vm615_vm5, %vm616_vm6 }
  0x15   : > { %s2219_s23 = sshll.u32 %s398_s21, 3  ;;  %s3692_s11 = smov (!%p404_p7, %s2221_s11), 0 }
  0x16   : > { %s2860_s12 = scalar_lea.vmem %s3605_s0, %s2219_s23  ;;  %s3694_s22 = smov (!%p421_p9, %s420_s22), 15 }
  0x17   : > { %s3696_s11 = smov (!%p2222_p8, %s3692_s11), 15  ;;  %s3698_s22 = smov (!%p421_p9, %s3694_s22), 15  ;;  %v466_v6 = vld [vmem:[%s2860_s12] sm:$0xff]  ;;  %v467_v7 = vld [vmem:[%s2860_s12 + $0x8] sm:$0xff]  ;;  %v468_v8 = vld [vmem:[%s2860_s12 + $0x10] sm:$0xff] }
  0x18   : > { %s2227_s13 = sshll.u32 %s3696_s11, 1  ;;  %s2238_s14 = sshll.u32 %s395_s16, 2  ;;  %v469_v9 = vld [vmem:[%s2860_s12 + $0x18] sm:$0xff]  ;;  %v2871_v10 = vpack.c.bf16 %v467_v7, %v466_v6  ;;  %v470_v13 = vld [vmem:[%s2860_s12 + $0x20] sm:$0xff]  ;;  %v471_v14 = vld [vmem:[%s2860_s12 + $0x28] sm:$0xff] }
  0x19   : > { %s2234_s10 = sshll.u32 %s3698_s22, 1  ;;  %s2239_s15 = sshll.u32 %s3690_s25, 6  ;;  %v2876_v11 = vpack.c.bf16 %v469_v9, %v468_v8  ;;  %v472_v16 = vld [vmem:[%s2860_s12 + $0x30] sm:$0xff]  ;;  %v473_v17 = vld [vmem:[%s2860_s12 + $0x38] sm:$0xff]  ;;  %v2890_v22 = vpack.c.bf16 %v471_v14, %v470_v13  ;;  %v474_v36 = vld [vmem:[%s2860_s12 + $0x40] sm:$0xff] }
  0x1a   : > { %s412_s17 = sadd.s32 %s2227_s13, %s2218_s19  ;;  %s429_s18 = sadd.s32 %s2234_s10, %s2218_s19  ;;  %v500_v12 = vshrl.u32 %v2871_v10, 16  ;;  %v503_v21 = vshll.u32 %v2871_v10, 16  ;;  %v2892_v23 = vpack.c.bf16 %v473_v17, %v472_v16  ;;  %v475_v37 = vld [vmem:[%s2860_s12 + $0x48] sm:$0xff]  ;;  %v476_v42 = vld [vmem:[%s2860_s12 + $0x50] sm:$0xff]  ;;  %v477_v43 = vld [vmem:[%s2860_s12 + $0x58] sm:$0xff] }
  0x1b   : > { %s2863_s20 = sadd.s32 %s2239_s15, %s2238_s14  ;;  %s2229_s21 = sshll.u32 %s412_s17, 3  ;;  %v507_v15 = vshrl.u32 %v2876_v11, 16  ;;  %v510_v26 = vshll.u32 %v2876_v11, 16  ;;  %v514_v35 = vshrl.u32 %v2890_v22, 16  ;;  %v517_v47 = vshll.u32 %v2890_v22, 16  ;;  %v478_v0 = vld [vmem:[%s2860_s12 + $0x60] sm:$0xff] }
  0x1c   : > { %p450_p10 = scmp.gt.s32.totalorder %s2738_s24, 0  ;;  %s2236_s23 = sshll.u32 %s429_s18, 3  ;;  %v502_v20 = vrot.slane %v500_v12, 7  ;;  %v521_v38 = vshrl.u32 %v2892_v23, 16  ;;  %v2939_v48 = vpack.c.bf16 %v475_v37, %v474_v36  ;;  %v524_v52 = vshll.u32 %v2892_v23, 16  ;;  %v479_v1 = vld [vmem:[%s2860_s12 + $0x68] sm:$0xff] }
  0x1d   : > { %p459_p11 = scmp.lt.s32.totalorder %s2738_s24, 1  ;;  %s414_s19 = scalar_lea.vmem %s3606_s1, %s2229_s21  ;;  %v509_v25 = vrot.slane %v507_v15, 7  ;;  %v516_v51 = vrot.slane %v514_v35, 7  ;;  %v2948_v53 = vpack.c.bf16 %v477_v43, %v476_v42  ;;  %v2996_v6 = vpack.c.bf16 %v479_v1, %v478_v0 }
  0x1e   : > { %s451_s8 = scalar_select %p450_p10, 1, 0  ;;  %v505_v34 = vor.u32 %v503_v21, %v502_v20  ;;  %v523_v56 = vrot.slane %v521_v38, 7  ;;  %v528_v62 = vshrl.u32 %v2939_v48, 16  ;;  %v531_v5 = vshll.u32 %v2939_v48, 16 }
  0x1f   : > { %s460_s25 = scalar_select %p459_p11, 1, 0  ;;  %v512_v41 = vor.u32 %v510_v26, %v509_v25  ;;  %v519_v61 = vor.u32 %v517_v47, %v516_v51  ;;  %v535_v2 = vshrl.u32 %v2948_v53, 16  ;;  %v538_v9 = vshll.u32 %v2948_v53, 16 }
  0x20   : > { %s452_s22 = scvt.s32.f32 %s451_s8  ;;  %s431_s14 = scalar_lea.vmem %s3607_s2, %s2236_s23  ;;  %v2943_v50 = vsel %vm2924_vm4, 0, %v505_v34  ;;  %v526_v63 = vor.u32 %v524_v52, %v523_v56  ;;  %v530_v4 = vrot.slane %v528_v62, 7  ;;  %v542_v16 = vshrl.u32 %v2996_v6, 16 }
  0x21   : > { %s461_s10 = scvt.s32.f32 %s460_s25  ;;  %v2954_v55 = vsel %vm2924_vm4, 0, %v512_v41  ;;  %v2991_v3 = vsel %vm2924_vm4, 0, %v519_v61  ;;  %v537_v8 = vrot.slane %v535_v2, 7  ;;  %v589_v36 = vrot.slane %v510_v26, 1 }
  0x22   : > { %p2704_p12 = scmp.gt.f32.partialorder %s452_s22, 1056964608  ;;  %v3000_v7 = vsel %vm2924_vm4, 0, %v526_v63  ;;  %v533_v14 = vor.u32 %v531_v5, %v530_v4  ;;  %v591_v42 = vrot.slane %v517_v47, 1  ;;  %v1141_v43 = vsel %vm648_vm0, %v2908_v32, 0 }
  0x23   : > { %p2710_p13 = scmp.gt.f32.partialorder %s461_s10, 1056964608  ;;  %v540_v17 = vor.u32 %v538_v9, %v537_v8  ;;  %v595_v47 = vrot.slane %v531_v5, 1  ;;  %v1262_v51 = vsel %vm648_vm0, %v2968_v59, 0 }
  0x24   : > { %s2705_s24 = scalar_select %p2704_p12, 255, 0 }
  0x25   : > { %s2711_s15 = scalar_select %p2710_p13, 255, 0 }
  0x26   : > { %v2706_v18 = vld [vmem:[%s414_s19] sm:%s2705_s24]  ;;  %v2709_v19 = vld [vmem:[%s414_s19 + $0x8] sm:%s2705_s24] }
  0x27   : > { %v2894_v24 = vpack.c.bf16 %v2709_v19, %v2706_v18  ;;  %v2712_v27 = vld [vmem:[%s431_s14] sm:%s2711_s15]  ;;  %v2715_v29 = vld [vmem:[%s431_s14 + $0x8] sm:%s2711_s15]  ;;  %s2240_s15 = sshll.u32 %s2863_s20, 2  ;;  %s2756_s20 = smov 112  }
  0x28   : > { %v2910_v33 = vpack.c.bf16 %v2715_v29, %v2712_v27  ;;  %v3024_v27 = vsel %vm2924_vm4, 0, %v533_v14  ;;  %v545_v29 = vshll.u32 %v2996_v6, 16  ;;  %s3493_s21 = scalar_lea.vmem %s3612_s7, %s2240_s15 }
  0x29   : > { %2475 = vmatprep.mubr.msk.bf16.mxu0 %vm631_vm1, %v2894_v24  ;;  %v493_v30 = vshrl.u32 %v2894_v24, 16  ;;  %v496_v31 = vshll.u32 %v2894_v24, 16  ;;  %v3033_v24 = vsel %vm2924_vm4, 0, %v540_v17 }
  0x2a   : > { %2476 = vmatmul.mubr.msk.bf16.vlgmr.msra.gmra.mxu0 %vm631_vm1, %v2871_v10  ;;  %v556_v44 = vshrl.u32 %v2910_v33, 16  ;;  %v559_v45 = vshll.u32 %v2910_v33, 16  ;;  %v599_v61 = vrot.slane %v545_v29, 1 }
  0x2b   : > { %2510 = vmatpush3.bf16.msra.mxu0 %v900_v28  ;;  %v495_v39 = vrot.slane %v493_v30, 7  ;;  %2479 = vmatprep.mubr.msk.bf16.mxu0 %vm631_vm1, %v2876_v11  ;;  %v585_v13 = vrot.slane %v496_v31, 1  ;;  %v544_v28 = vrot.slane %v542_v16, 7 }
  0x2c   : > { %2657 = vmatprep.subr.msk.bf16.mxu0 %vm648_vm0, %v2908_v32  ;;  %v558_v49 = vrot.slane %v556_v44, 7  ;;  %v603_v18 = vrot.slane %v559_v45, 1  ;;  %v592_v32 = vor.u32 %v591_v42, %v514_v35  ;;  %v2303_v35 = vld [vmem:[%s3608_s3 + $0xe] sm:$0x3]  ;;  %v600_v0 = vor.u32 %v599_v61, %v542_v16 }
  0x2d   : > { %v498_v46 = vor.u32 %v496_v31, %v495_v39  ;;  %v586_v19 = vor.u32 %v585_v13, %v493_v30  ;;  %v587_v31 = vrot.slane %v503_v21, 1  ;;  %v547_v21 = vor.u32 %v545_v29, %v544_v28  ;;  %v2312_v13 = vld [vmem:[%s3608_s3 + $0x10] sm:$0x3] }
  0x2e   : > { %v2958_v57 = vor.u32 %v559_v45, %v558_v49  ;;  %v3020_v25 = vor.u32 %v603_v18, %v556_v44  ;;  %v590_v39 = vor.u32 %v589_v36, %v507_v15  ;;  %v2294_v15 = vld [vmem:[%s3608_s3 + $0xc] sm:$0x3]  ;;  %v625_v4 = vsel %vm3016_vm7, %v600_v0, 0 }
  0x2f   : > { %v575_v54 = vsel %vm2924_vm4, 0, %v498_v46  ;;  %v618_v34 = vsel %vm3016_vm7, %v586_v19, 0  ;;  %v588_v37 = vor.u32 %v587_v31, %v500_v12  ;;  %v3055_v26 = vsel %vm2924_vm4, 0, %v547_v21 }
  0x30   : > { %2493 = vmatprep.mubr.msk.bf16.mxu1 %vm631_vm1, %v575_v54  ;;  %v584_v60 = vsel %vm2924_vm4, 0, %v2958_v57  ;;  %v627_v30 = vsel %vm3016_vm7, %v3020_v25, 0  ;;  %v3065_v44 = vsel %vm3016_vm7, %v590_v39, 0  ;;  %v593_v12 = vrot.slane %v524_v52, 1  ;;  %v480_v52 = vld [vmem:[%s2860_s12 + $0x70] sm:$0xff]  ;;  %v481_v54 = vld [vmem:[%s2860_s12 + $0x78] sm:$0xff] }
  0x31   : > { %2494 = vmatmul.mubr.msk.bf16.vlgmr.msra.gmra.mxu1 %vm631_vm1, %v2943_v50  ;;  %v619_v41 = vsel %vm3016_vm7, %v588_v37, 0  ;;  %v3086_v46 = vsel %vm3016_vm7, %v592_v32, 0  ;;  %v1624_v18 = vsel %vm648_vm0, %v2312_v13, 0 }
  0x32   : > { %2480 = vmatmul.mubr.msk.bf16.gmra.mxu0 %vm631_vm1, %v2890_v22  ;;  %2497 = vmatprep.mubr.msk.bf16.mxu1 %vm631_vm1, %v2954_v55  ;;  %v594_v45 = vor.u32 %v593_v12, %v521_v38  ;;  %v596_v38 = vor.u32 %v595_v47, %v528_v62 }
  0x33   : > { %2483 = vmatprep.mubr.msk.bf16.mxu0 %vm631_vm1, %v2892_v23  ;;  %2528 = vmatpush3.bf16.msra.mxu1 %v1021_v58  ;;  %v490_v58 = vpack.c.bf16 %v481_v54, %v480_v52 }
  0x34   : > { %2658 = vmatprep.subr.msk.bf16.mxu1 %vm648_vm0, %v2968_v59  ;;  %v3090_v49 = vsel %vm3016_vm7, %v594_v45, 0  ;;  %v3114_v59 = vsel %vm3016_vm7, %v596_v38, 0 }
  0x35   : > { %v549_v62 = vshrl.u32 %v490_v58, 16 }
  0x37   : > { %v551_v1 = vrot.slane %v549_v62, 7 }
  0x39   : > { %2498 = vmatmul.mubr.msk.bf16.gmra.mxu1 %vm631_vm1, %v2991_v3 }
  0x3a   : > { %2484 = vmatmul.mubr.msk.bf16.gmra.mxu0 %vm631_vm1, %v2939_v48  ;;  %2501 = vmatprep.mubr.msk.bf16.mxu1 %vm631_vm1, %v3000_v7 }
  0x3b   : > { %2487 = vmatprep.mubr.msk.bf16.mxu0 %vm631_vm1, %v2948_v53 }
  0x41   : > { %2502 = vmatmul.mubr.msk.bf16.gmra.mxu1 %vm631_vm1, %v3024_v27 }
  0x42   : > { %2488 = vmatmul.mubr.msk.bf16.gmra.mxu0 %vm631_vm1, %v2996_v6  ;;  %2505 = vmatprep.mubr.msk.bf16.mxu1 %vm631_vm1, %v3033_v24 }
  0x43   : > { %2511 = vmatprep.mubr.msk.bf16.mxu0 %vm631_vm1, %v618_v34 }
  0x49   : > { %2506 = vmatmul.mubr.msk.bf16.gmra.mxu1 %vm631_vm1, %v3055_v26 }
  0x4a   : > { %2512 = vmatmul.mubr.msk.bf16.vlgmr.msra.gmra.mxu0 %vm631_vm1, %v619_v41  ;;  %2529 = vmatprep.mubr.msk.bf16.mxu1 %vm631_vm1, %v2943_v50  ;;  %v597_v50 = vrot.slane %v538_v9, 1  ;;  %v1383_v9 = vsel %vm648_vm0, %v2294_v15, 0 }
  0x4b   : > { %2546 = vmatpush3.bf16.msra.mxu0 %v1141_v43  ;;  %2515 = vmatprep.mubr.msk.bf16.mxu0 %vm631_vm1, %v3065_v44 }
  0x4c   : > { %2659 = vmatprep.subr.msk.bf16.mxu0 %vm648_vm0, %v2294_v15  ;;  %v598_v56 = vor.u32 %v597_v50, %v535_v2  ;;  %v552_v2 = vshll.u32 %v490_v58, 16 }
  0x4e   : > { %v3118_v63 = vsel %vm3016_vm7, %v598_v56, 0  ;;  %v554_v5 = vor.u32 %v552_v2, %v551_v1  ;;  %v601_v14 = vrot.slane %v552_v2, 1 }
  0x50   : > { %v583_v8 = vsel %vm2924_vm4, 0, %v554_v5  ;;  %v602_v16 = vor.u32 %v601_v14, %v549_v62 }
  0x51   : > { %2530 = vmatmul.mubr.msk.bf16.vlgmr.msra.gmra.mxu1 %vm631_vm1, %v2954_v55 }
  0x52   : > { %2516 = vmatmul.mubr.msk.bf16.gmra.mxu0 %vm631_vm1, %v3086_v46  ;;  %2533 = vmatprep.mubr.msk.bf16.mxu1 %vm631_vm1, %v2991_v3  ;;  %v626_v17 = vsel %vm3016_vm7, %v602_v16, 0 }
  0x53   : > { %2519 = vmatprep.mubr.msk.bf16.mxu0 %vm631_vm1, %v3090_v49  ;;  %2564 = vmatpush3.bf16.msra.mxu1 %v1262_v51 }
  0x54   : > { %2660 = vmatprep.subr.msk.bf16.mxu1 %vm648_vm0, %v2303_v35 }
  0x59   : > { %2534 = vmatmul.mubr.msk.bf16.gmra.mxu1 %vm631_vm1, %v3000_v7 }
  0x5a   : > { %2520 = vmatmul.mubr.msk.bf16.gmra.mxu0 %vm631_vm1, %v3114_v59  ;;  %2537 = vmatprep.mubr.msk.bf16.mxu1 %vm631_vm1, %v3024_v27 }
  0x5b   : > { %2523 = vmatprep.mubr.msk.bf16.mxu0 %vm631_vm1, %v3118_v63 }
  0x61   : > { %2538 = vmatmul.mubr.msk.bf16.gmra.mxu1 %vm631_vm1, %v3033_v24 }
  0x62   : > { %2524 = vmatmul.mubr.msk.bf16.gmra.mxu0 %vm631_vm1, %v625_v4  ;;  %2541 = vmatprep.mubr.msk.bf16.mxu1 %vm631_vm1, %v3055_v26 }
  0x63   : > { %2547 = vmatprep.mubr.msk.bf16.mxu0 %vm631_vm1, %v2871_v10  ;;  %v1503_v10 = vsel %vm648_vm0, %v2303_v35, 0 }
  0x69   : > { %2542 = vmatmul.mubr.msk.bf16.gmra.mxu1 %vm631_vm1, %v583_v8 }
  0x6a   : > { %2548 = vmatmul.mubr.msk.bf16.vlgmr.msra.gmra.mxu0 %vm631_vm1, %v2876_v11  ;;  %2565 = vmatprep.mubr.msk.bf16.mxu1 %vm631_vm1, %v619_v41 }
  0x6b   : > { %2582 = vmatpush3.bf16.msra.mxu0 %v1383_v9  ;;  %2551 = vmatprep.mubr.msk.bf16.mxu0 %vm631_vm1, %v2890_v22 }
  0x6c   : > { %2661 = vmatprep.subr.msk.bf16.mxu0 %vm648_vm0, %v2312_v13 }
  0x71   : > { %2566 = vmatmul.mubr.msk.bf16.vlgmr.msra.gmra.mxu1 %vm631_vm1, %v3065_v44 }
  0x72   : > { %2552 = vmatmul.mubr.msk.bf16.gmra.mxu0 %vm631_vm1, %v2892_v23  ;;  %2569 = vmatprep.mubr.msk.bf16.mxu1 %vm631_vm1, %v3086_v46 }
  0x73   : > { %2555 = vmatprep.mubr.msk.bf16.mxu0 %vm631_vm1, %v2939_v48  ;;  %2600 = vmatpush3.bf16.msra.mxu1 %v1503_v10 }
  0x79   : > { %2570 = vmatmul.mubr.msk.bf16.gmra.mxu1 %vm631_vm1, %v3090_v49 }
  0x7a   : > { %2556 = vmatmul.mubr.msk.bf16.gmra.mxu0 %vm631_vm1, %v2948_v53  ;;  %2573 = vmatprep.mubr.msk.bf16.mxu1 %vm631_vm1, %v3114_v59 }
  0x7b   : > { %2559 = vmatprep.mubr.msk.bf16.mxu0 %vm631_vm1, %v2996_v6 }
  0x81   : > { %2574 = vmatmul.mubr.msk.bf16.gmra.mxu1 %vm631_vm1, %v3118_v63 }
  0x82   : > { %2560 = vmatmul.mubr.msk.bf16.gmra.mxu0 %vm631_vm1, %v490_v58  ;;  %2577 = vmatprep.mubr.msk.bf16.mxu1 %vm631_vm1, %v625_v4 }
  0x83   : > { %2583 = vmatprep.mubr.msk.bf16.mxu0 %vm631_vm1, %v2954_v55 }
  0x89   : > { %2578 = vmatmul.mubr.msk.bf16.gmra.mxu1 %vm631_vm1, %v626_v17 }
  0x8a   : > { %2584 = vmatmul.mubr.msk.bf16.vlgmr.msra.gmra.mxu0 %vm631_vm1, %v2991_v3  ;;  %2601 = vmatprep.mubr.msk.bf16.mxu1 %vm631_vm1, %v2876_v11  ;;  %v1786_v11 = vld [vmem:[%s3610_s5] sm:$0x3] }
  0x8b   : > { %2618 = vmatpush3.bf16.msra.mxu0 %v1624_v18  ;;  %2587 = vmatprep.mubr.msk.bf16.mxu0 %vm631_vm1, %v3000_v7 }
  0x8c   : > { %2662 = vmatprep.subr.msk.bf16.mxu1 %vm648_vm0, %v1786_v11 }
  0x91   : > { %2602 = vmatmul.mubr.msk.bf16.vlgmr.msra.gmra.mxu1 %vm631_vm1, %v2890_v22  ;;  %v1819_v22 = vsel %vm648_vm0, %v1786_v11, 0 }
  0x92   : > { %2588 = vmatmul.mubr.msk.bf16.gmra.mxu0 %vm631_vm1, %v3024_v27  ;;  %2605 = vmatprep.mubr.msk.bf16.mxu1 %vm631_vm1, %v2892_v23 }
  0x93   : > { %2591 = vmatprep.mubr.msk.bf16.mxu0 %vm631_vm1, %v3033_v24  ;;  %2636 = vmatpush3.bf16.msra.mxu1 %v1819_v22 }
  0x99   : > { %2606 = vmatmul.mubr.msk.bf16.gmra.mxu1 %vm631_vm1, %v2939_v48 }
  0x9a   : > { %2592 = vmatmul.mubr.msk.bf16.gmra.mxu0 %vm631_vm1, %v3055_v26  ;;  %2609 = vmatprep.mubr.msk.bf16.mxu1 %vm631_vm1, %v2948_v53 }
  0x9b   : > { %2595 = vmatprep.mubr.msk.bf16.mxu0 %vm631_vm1, %v583_v8 }
  0xa1   : > { %2610 = vmatmul.mubr.msk.bf16.gmra.mxu1 %vm631_vm1, %v2996_v6 }
  0xa2   : > { %2596 = vmatmul.mubr.msk.bf16.gmra.mxu0 %vm631_vm1, %v584_v60  ;;  %2613 = vmatprep.mubr.msk.bf16.mxu1 %vm631_vm1, %v490_v58 }
  0xa3   : > { %2619 = vmatprep.mubr.msk.bf16.mxu0 %vm631_vm1, %v3065_v44 }
  0xa9   : > { %2614 = vmatmul.mubr.msk.bf16.gmra.mxu1 %vm631_vm1, %v2910_v33 }
  0xaa   : > { %2620 = vmatmul.mubr.msk.bf16.vlgmr.msra.gmra.mxu0 %vm631_vm1, %v3086_v46 }
  0xab   : > { %2623 = vmatprep.mubr.msk.bf16.mxu0 %vm631_vm1, %v3090_v49 }
  0xb2   : > { %2624 = vmatmul.mubr.msk.bf16.gmra.mxu0 %vm631_vm1, %v3114_v59 }
  0xb3   : > { %2627 = vmatprep.mubr.msk.bf16.mxu0 %vm631_vm1, %v3118_v63 }
  0xba   : > { %2628 = vmatmul.mubr.msk.bf16.gmra.mxu0 %vm631_vm1, %v625_v4 }
  0xbb   : > { %2631 = vmatprep.mubr.msk.bf16.mxu0 %vm631_vm1, %v626_v17 }
  0xc2   : > { %2632 = vmatmul.mubr.msk.bf16.gmra.mxu0 %vm631_vm1, %v627_v30 }
  0xea   : > { %v2477_v23 = vpop.f32.mrf.mxu0 }
  0xec   : > { %v686_v33 = vpop.f32.mrf.mxu0 }
  0xee   : > { %v2478_v40 = vpop.f32.mrf.mxu0 }
  0xf0   : > { %v689_v48 = vpop.f32.mrf.mxu0 }
  0xf1   : > { %v2495_v53 = vpop.f32.mrf.mxu1 }
  0xf2   : > { %v819_v55 = vadd.f32 %v2495_v53, %v2477_v23  ;;  %v2481_v57 = vpop.f32.mrf.mxu0 }
  0xf3   : > { %v810_v60 = vpop.f32.mrf.mxu1 }
  0xf4   : > { %v811_v3 = vadd.f32 %v810_v60, %v686_v33  ;;  %v702_v6 = vpop.f32.mrf.mxu0 }
  0xf5   : > { %v2496_v7 = vpop.f32.mrf.mxu1 }
  0xf6   : > { %v822_v19 = vadd.f32 %v2496_v7, %v2478_v40  ;;  %v2482_v20 = vpop.f32.mrf.mxu0 }
  0xf7   : > { %v813_v25 = vpop.f32.mrf.mxu1 }
  0xf8   : > { %v814_v27 = vadd.f32 %v813_v25, %v689_v48  ;;  %v705_v28 = vpop.f32.mrf.mxu0 }
  0xf9   : > { %v2499_v29 = vpop.f32.mrf.mxu1 }
  0xfa   : > { %v835_v31 = vadd.f32 %v2499_v29, %v2481_v57  ;;  %v2485_v24 = vpop.f32.mrf.mxu0 }
  0xfb   : > { %v826_v30 = vpop.f32.mrf.mxu1 }
  0xfc   : > { %v827_v34 = vadd.f32 %v826_v30, %v702_v6  ;;  %v718_v36 = vpop.f32.mrf.mxu0 }
  0xfd   : > { %v2500_v21 = vpop.f32.mrf.mxu1 }
  0xfe   : > { %v838_v37 = vadd.f32 %v2500_v21, %v2482_v20  ;;  %v2486_v39 = vpop.f32.mrf.mxu0 }
  0xff   : > { %v829_v26 = vpop.f32.mrf.mxu1 }
 0x100   : > { %v830_v41 = vadd.f32 %v829_v26, %v705_v28  ;;  %v721_v42 = vpop.f32.mrf.mxu0 }
 0x101   : > { %v2503_v43 = vpop.f32.mrf.mxu1 }
 0x102   : > { %v851_v44 = vadd.f32 %v2503_v43, %v2485_v24  ;;  %v2489_v12 = vpop.f32.mrf.mxu0 }
 0x103   : > { %v842_v15 = vpop.f32.mrf.mxu1 }
 0x104   : > { %v843_v32 = vadd.f32 %v842_v15, %v718_v36  ;;  %v734_v45 = vpop.f32.mrf.mxu0 }
 0x105   : > { %v2504_v46 = vpop.f32.mrf.mxu1 }
 0x106   : > { %v854_v47 = vadd.f32 %v2504_v46, %v2486_v39  ;;  %v2490_v49 = vpop.f32.mrf.mxu0 }
 0x107   : > { %v845_v50 = vpop.f32.mrf.mxu1 }
 0x108   : > { %v846_v51 = vadd.f32 %v845_v50, %v721_v42  ;;  %v737_v35 = vpop.f32.mrf.mxu0 }
 0x109   : > { %v2507_v38 = vpop.f32.mrf.mxu1 }
 0x10a   : > { %v867_v52 = vadd.f32 %v2507_v38, %v2489_v12  ;;  %v2513_v54 = vpop.f32.mrf.mxu0 }
 0x10b   : > { %v3232_v56 = vadd.f32 %v2513_v54, %v819_v55  ;;  %v858_v58 = vpop.f32.mrf.mxu1 }
 0x10c   : > { %v859_v59 = vadd.f32 %v858_v58, %v734_v45  ;;  %v936_v61 = vpop.f32.mrf.mxu0 }
 0x10d   : > { %v3234_v63 = vadd.f32 %v936_v61, %v811_v3  ;;  %v2508_v62 = vpop.f32.mrf.mxu1 }
 0x10e   : > { %v870_v0 = vadd.f32 %v2508_v62, %v2490_v49  ;;  %v2514_v1 = vpop.f32.mrf.mxu0 }
 0x10f   : > { %v3236_v2 = vadd.f32 %v2514_v1, %v822_v19  ;;  %v861_v4 = vpop.f32.mrf.mxu1 }
 0x110   : > { %v862_v5 = vadd.f32 %v861_v4, %v737_v35  ;;  %v939_v8 = vpop.f32.mrf.mxu0 }
 0x111   : > { %v3238_v9 = vadd.f32 %v939_v8, %v814_v27  ;;  %v3240_v13 = vpop.f32.mrf.mxu1 }
 0x112   : > { %v2517_v10 = vpop.f32.mrf.mxu0 }
 0x113   : > { %v3242_v14 = vadd.f32 %v2517_v10, %v835_v31  ;;  %v3244_v16 = vpop.f32.mrf.mxu1 }
 0x114   : > { %v952_v17 = vpop.f32.mrf.mxu0 }
 0x115   : > { %v3246_v18 = vadd.f32 %v952_v17, %v827_v34  ;;  %v3248_v11 = vpop.f32.mrf.mxu1 }
 0x116   : > { %v2518_v22 = vpop.f32.mrf.mxu0 }
 0x117   : > { %v3250_v23 = vadd.f32 %v2518_v22, %v838_v37  ;;  %v3252_v33 = vpop.f32.mrf.mxu1 }
 0x118   : > { %v955_v40 = vpop.f32.mrf.mxu0 }
 0x119   : > { %v3254_v48 = vadd.f32 %v955_v40, %v830_v41  ;;  %v3256_v53 = vpop.f32.mrf.mxu1 }
 0x11a   : > { %v2521_v55 = vpop.f32.mrf.mxu0 }
 0x11b   : > { %v3258_v57 = vadd.f32 %v2521_v55, %v851_v44  ;;  %v3260_v60 = vpop.f32.mrf.mxu1 }
 0x11c   : > { %v968_v3 = vpop.f32.mrf.mxu0 }
 0x11d   : > { %v3262_v6 = vadd.f32 %v968_v3, %v843_v32  ;;  %v3264_v7 = vpop.f32.mrf.mxu1 }
 0x11e   : > { %v2522_v19 = vpop.f32.mrf.mxu0 }
 0x11f   : > { %v3266_v20 = vadd.f32 %v2522_v19, %v854_v47  ;;  %v3268_v25 = vpop.f32.mrf.mxu1 }
 0x120   : > { %v971_v27 = vpop.f32.mrf.mxu0 }
 0x121   : > { %v3270_v28 = vadd.f32 %v971_v27, %v846_v51  ;;  %v3272_v29 = vpop.f32.mrf.mxu1 }
 0x122   : > { %v2525_v31 = vpop.f32.mrf.mxu0 }
 0x123   : > { %v3274_v24 = vadd.f32 %v2525_v31, %v867_v52  ;;  %v3276_v30 = vpop.f32.mrf.mxu1 }
 0x124   : > { %v984_v34 = vpop.f32.mrf.mxu0 }
 0x125   : > { %v3278_v36 = vadd.f32 %v984_v34, %v859_v59  ;;  %v3280_v21 = vpop.f32.mrf.mxu1 }
 0x126   : > { %v2526_v37 = vpop.f32.mrf.mxu0 }
 0x127   : > { %3617 = vst [vmem:[#allocation2_spill] sm:$0xff] %v3278_v36  ;;  %v3282_v39 = vadd.f32 %v2526_v37, %v870_v0  ;;  %v3284_v26 = vpop.f32.mrf.mxu1 }
 0x128   : > { %v987_v41 = vpop.f32.mrf.mxu0 }
 0x129   : > { %3618 = vst [vmem:[#allocation3_spill] sm:$0xff] %v3282_v39  ;;  %v3286_v42 = vadd.f32 %v987_v41, %v862_v5  ;;  %v3288_v43 = vpop.f32.mrf.mxu1 }
 0x12a   : > { %v2549_v44 = vpop.f32.mrf.mxu0 }
 0x12b   : > { %3619 = vst [vmem:[#allocation4_spill] sm:$0xff] %v3286_v42  ;;  %v3290_v12 = vpop.f32.mrf.mxu1 }
 0x12c   : > { %3620 = vst [vmem:[#allocation5_spill] sm:$0xff] %v3290_v12  ;;  %v1177_v15 = vpop.f32.mrf.mxu0 }
 0x12d   : > { %v3292_v32 = vpop.f32.mrf.mxu1 }
 0x12e   : > { %3621 = vst [vmem:[#allocation6_spill] sm:$0xff] %v3292_v32  ;;  %v2550_v45 = vpop.f32.mrf.mxu0 }
 0x12f   : > { %v3294_v46 = vpop.f32.mrf.mxu1 }
 0x130   : > { %3622 = vst [vmem:[#allocation7_spill] sm:$0xff] %v3294_v46  ;;  %v3296_v47 = vpop.f32.mrf.mxu0 }
 0x131   : > { %v2567_v49 = vpop.f32.mrf.mxu1 }
 0x132   : > { %v3298_v50 = vpop.f32.mrf.mxu0 }
 0x133   : > { %v1298_v51 = vpop.f32.mrf.mxu1 }
 0x134   : > { %v3300_v35 = vpop.f32.mrf.mxu0 }
 0x135   : > { %v2568_v38 = vpop.f32.mrf.mxu1 }
 0x136   : > { %v3302_v52 = vpop.f32.mrf.mxu0 }
 0x137   : > { %v3304_v54 = vpop.f32.mrf.mxu1 }
 0x138   : > { %v3306_v58 = vpop.f32.mrf.mxu0 }
 0x139   : > { %v3308_v59 = vpop.f32.mrf.mxu1 }
 0x13a   : > { %v3310_v61 = vpop.f32.mrf.mxu0 }
 0x13b   : > { %v3312_v62 = vpop.f32.mrf.mxu1 }
 0x13c   : > { %v3314_v0 = vpop.f32.mrf.mxu0 }
 0x13d   : > { %3623 = vst [vmem:[#allocation8_spill] sm:$0xff] %v3314_v0  ;;  %v3316_v1 = vpop.f32.mrf.mxu1 }
 0x13e   : > { %v3318_v4 = vpop.f32.mrf.mxu0 }
 0x13f   : > { %3624 = vst [vmem:[#allocation9_spill] sm:$0xff] %v3318_v4  ;;  %v3320_v5 = vpop.f32.mrf.mxu1 }
 0x140   : > { %3625 = vst [vmem:[#allocation10_spill] sm:$0xff] %v3320_v5  ;;  %v3322_v8 = vpop.f32.mrf.mxu0 }
 0x141   : > { %3626 = vst [vmem:[#allocation11_spill] sm:$0xff] %v3322_v8  ;;  %v3324_v10 = vpop.f32.mrf.mxu1 }
 0x142   : > { %3627 = vst [vmem:[#allocation12_spill] sm:$0xff] %v3324_v10  ;;  %v3326_v17 = vpop.f32.mrf.mxu0  ;;  %v1122_v10 = vadd.f32 %v3240_v13, %v3232_v56  ;;  %v1121_v56 = vadd.f32 %v3252_v33, %v3238_v9  ;;  %v1127_v9 = vadd.f32 %v3264_v7, %v3250_v23  ;;  %v3407_v7 = vld [vmem:[%s3609_s4] ss:$0 sm:$0xff] }
 0x143   : > { %3628 = vst [vmem:[#allocation13_spill] sm:$0xff] %v3326_v17  ;;  %v3328_v22 = vpop.f32.mrf.mxu1 }
 0x144   : > { %3629 = vst [vmem:[#allocation14_spill] sm:$0xff] %v3328_v22  ;;  %v3330_v40 = vpop.f32.mrf.mxu0 }
 0x145   : > { %3630 = vst [vmem:[#allocation15_spill] sm:$0xff] %v3330_v40  ;;  %v3332_v55 = vpop.f32.mrf.mxu1 }
 0x146   : > { %3631 = vst [vmem:[#allocation16_spill] sm:$0xff] %v3332_v55  ;;  %v3334_v3 = vpop.f32.mrf.mxu0 }
 0x147   : > { %3632 = vst [vmem:[#allocation17_spill] sm:$0xff] %v3334_v3  ;;  %v3336_v19 = vpop.f32.mrf.mxu1 }
 0x148   : > { %3633 = vst [vmem:[#allocation18_spill] sm:$0xff] %v3336_v19  ;;  %v3338_v27 = vpop.f32.mrf.mxu0 }
 0x149   : > { %3634 = vst [vmem:[#allocation19_spill] sm:$0xff] %v3338_v27  ;;  %v3340_v31 = vpop.f32.mrf.mxu1 }
 0x14a   : > { %3635 = vst [vmem:[#allocation20_spill] sm:$0xff] %v3340_v31  ;;  %v2585_v34 = vpop.f32.mrf.mxu0 }
 0x14b   : > { %v3342_v37 = vpop.f32.mrf.mxu1 }
 0x14c   : > { %3636 = vst [vmem:[#allocation21_spill] sm:$0xff] %v3342_v37  ;;  %v1419_v41 = vpop.f32.mrf.mxu0 }
 0x14d   : > { %v3344_v46 = vpop.f32.mrf.mxu1 }
 0x14e   : > { %3637 = vst [vmem:[#allocation22_spill] sm:$0xff] %v3344_v46  ;;  %v2586_v42 = vpop.f32.mrf.mxu0 }
 0x14f   : > { %v3346_v17 = vpop.f32.mrf.mxu1 }
 0x150   : > { %3638 = vst [vmem:[#allocation23_spill] sm:$0xff] %v3346_v17  ;;  %v1422_v40 = vpop.f32.mrf.mxu0 }
 0x151   : > { %v2603_v8 = vpop.f32.mrf.mxu1 }
 0x152   : > { %v2589_v55 = vpop.f32.mrf.mxu0 }
 0x153   : > { %v1539_v32 = vpop.f32.mrf.mxu1 }
 0x154   : > { %v3348_v3 = vpop.f32.mrf.mxu0 }
 0x155   : > { %v2604_v19 = vpop.f32.mrf.mxu1 }
 0x156   : > { %v3350_v39 = vpop.f32.mrf.mxu0 }
 0x157   : > { %3639 = vst [vmem:[#allocation24_spill] sm:$0xff] %v3350_v39  ;;  %v1542_v27 = vpop.f32.mrf.mxu1  ;;  %v1242_v39 = vadd.f32 %v2549_v44, %v1122_v10  ;;  %v1241_v10 = vadd.f32 %v3296_v47, %v1121_v56  ;;  %v1125_v47 = vadd.f32 %v3268_v25, %v3254_v48 }
 0x158   : > { %v3352_v31 = vpop.f32.mrf.mxu0 }
 0x159   : > { %3640 = vst [vmem:[#allocation25_spill] sm:$0xff] %v3352_v31  ;;  %v2607_v22 = vpop.f32.mrf.mxu1  ;;  %v1120_v31 = vadd.f32 %v3244_v16, %v3234_v63  ;;  %v1126_v63 = vadd.f32 %v3256_v53, %v3242_v14  ;;  %v1362_v14 = vadd.f32 %v3304_v54, %v1241_v10 }
 0x15a   : > { %v3354_v37 = vpop.f32.mrf.mxu0 }
 0x15b   : > { %3641 = vst [vmem:[#allocation26_spill] sm:$0xff] %v3354_v37  ;;  %v3356_v4 = vpop.f32.mrf.mxu1  ;;  %v1246_v33 = vadd.f32 %v3298_v50, %v1126_v63 }
 0x15c   : > { %3642 = vst [vmem:[#allocation27_spill] sm:$0xff] %v3356_v4  ;;  %v3358_v46 = vpop.f32.mrf.mxu0 }
 0x15d   : > { %3643 = vst [vmem:[#allocation28_spill] sm:$0xff] %v3358_v46  ;;  %v3362_v12 = vpop.f32.mrf.mxu1  ;;  %v1240_v46 = vadd.f32 %v1177_v15, %v1120_v31  ;;  %v1124_v15 = vadd.f32 %v3260_v60, %v3246_v18  ;;  %v1128_v18 = vadd.f32 %v3276_v30, %v3262_v6  ;;  %v1129_v6 = vadd.f32 %v3284_v26, %v3270_v28 }
 0x15e   : > { %v3360_v17 = vpop.f32.mrf.mxu0  ;;  %3645 = vst [vmem:[#allocation30_spill] sm:$0xff] %v3362_v12  ;;  %v1363_v12 = vadd.f32 %v2567_v49, %v1242_v39  ;;  %v1483_v49 = vadd.f32 %v1422_v40, %v1362_v14 }
 0x15f   : > { %3644 = vst [vmem:[#allocation29_spill] sm:$0xff] %v3360_v17  ;;  %v3372_v37 = vpop.f32.mrf.mxu1  ;;  %v1123_v17 = vadd.f32 %v3248_v11, %v3236_v2  ;;  %v1244_v60 = vadd.f32 %v3300_v35, %v1124_v15 }
 0x160   : > { %v3364_v36 = vpop.f32.mrf.mxu0  ;;  %v1603_v35 = vadd.f32 %v1542_v27, %v1483_v49  ;;  %v3649_v27 = vld [vmem:[#allocation24_spill] sm:$0xff]  ;;  %v3653_v10 = vld [vmem:[#allocation25_spill] sm:$0xff] }
 0x161   : > { %3646 = vst [vmem:[#allocation31_spill] sm:$0xff] %v3364_v36  ;;  %v1243_v13 = vadd.f32 %v2550_v45, %v1123_v17  ;;  %v1484_v36 = vadd.f32 %v2585_v34, %v1363_v12  ;;  %v3384_v16 = vpop.f32.mrf.mxu1  ;;  %v1365_v30 = vadd.f32 %v3312_v62, %v1244_v60  ;;  %v3658_v60 = vld [vmem:[#allocation14_spill] sm:$0xff] }
 0x162   : > { %v3368_v0 = vpop.f32.mrf.mxu0 }
 0x163   : > { %3647 = vst [vmem:[#allocation32_spill] sm:$0xff] %v3368_v0  ;;  %v1361_v0 = vadd.f32 %v1298_v51, %v1240_v46  ;;  %v1364_v2 = vadd.f32 %v2568_v38, %v1243_v13  ;;  %v1604_v39 = vadd.f32 %v2603_v8, %v1484_v36  ;;  %v1130_v36 = vadd.f32 %v3272_v29, %v3258_v57  ;;  %v3402_v23 = vpop.f32.mrf.mxu1  ;;  %v3652_v13 = vld [vmem:[#allocation12_spill] sm:$0xff] }
 0x164   : > { %v3374_v4 = vpop.f32.mrf.mxu0  ;;  %v1131_v57 = vadd.f32 %v3280_v21, %v3266_v20  ;;  %v1247_v29 = vadd.f32 %v3302_v52, %v1127_v9  ;;  %v1486_v21 = vadd.f32 %v3348_v3, %v1365_v30 }
 0x165   : > { %v1482_v11 = vadd.f32 %v1419_v41, %v1361_v0  ;;  %v1485_v53 = vadd.f32 %v2586_v42, %v1364_v2  ;;  %v1245_v0 = vadd.f32 %v3306_v58, %v1125_v47  ;;  %v2612_v28 = vpop.f32.mrf.mxu1  ;;  %v1250_v40 = vadd.f32 %v3310_v61, %v1130_v36  ;;  %v3657_v47 = vld [vmem:[#allocation9_spill] sm:$0xff] }
 0x166   : > { %v3378_v5 = vpop.f32.mrf.mxu0  ;;  %v1368_v20 = vadd.f32 %v3316_v1, %v1247_v29  ;;  %v1251_v36 = vadd.f32 %v3657_v47, %v1131_v57 }
 0x167   : > { %v1602_v45 = vadd.f32 %v1539_v32, %v1482_v11  ;;  %v1367_v32 = vadd.f32 %v3308_v59, %v1246_v33  ;;  %v1605_v48 = vadd.f32 %v2604_v19, %v1485_v53  ;;  %v1134_v59 = vadd.f32 %v3288_v43, %v3274_v24  ;;  %v3650_v43 = vld [vmem:[#allocation27_spill] sm:$0xff]  ;;  %v3654_v11 = vld [vmem:[#allocation30_spill] sm:$0xff] }
 0x168   : > { %v3386_v44 = vpop.f32.mrf.mxu0  ;;  %v1489_v24 = vadd.f32 %v3649_v27, %v1368_v20  ;;  %v1606_v58 = vadd.f32 %v3650_v43, %v1486_v21  ;;  %v1371_v63 = vadd.f32 %v3652_v13, %v1250_v40  ;;  %v3655_v53 = vld [vmem:[#allocation2_spill] sm:$0xff]  ;;  %v3664_v21 = vld [vmem:[#allocation28_spill] sm:$0xff]  ;;  %v3665_v40 = vld [vmem:[#allocation13_spill] sm:$0xff] }
 0x169   : > { %v1488_v51 = vadd.f32 %v2589_v55, %v1367_v32  ;;  %v3648_v55 = vld [vmem:[#allocation10_spill] sm:$0xff]  ;;  %v3670_v13 = vld [vmem:[#allocation31_spill] sm:$0xff] }
 0x16a   : > { %v2621_v12 = vpop.f32.mrf.mxu0  ;;  %v1366_v19 = vadd.f32 %v3648_v55, %v1245_v0  ;;  %v1609_v61 = vadd.f32 %v3654_v11, %v1489_v24  ;;  %v3663_v0 = vld [vmem:[#allocation16_spill] sm:$0xff]  ;;  %v1254_v55 = vadd.f32 %v3665_v40, %v1134_v59 }
 0x16b   : > { %v1725_v46 = vadd.f32 %v2621_v12, %v1604_v39  ;;  %v1608_v52 = vadd.f32 %v2607_v22, %v1488_v51  ;;  %v3651_v22 = vld [vmem:[#allocation8_spill] sm:$0xff]  ;;  %v1574_v39 = vpop.f32.mrf.mxu1  ;;  %v3661_v51 = vld [vmem:[#allocation6_spill] sm:$0xff]  ;;  %v1372_v20 = vadd.f32 %v3663_v0, %v1251_v36 }
 0x16c   : > { %v1660_v42 = vpop.f32.mrf.mxu0  ;;  %v1248_v56 = vadd.f32 %v3651_v22, %v1128_v18  ;;  %v1487_v2 = vadd.f32 %v3653_v10, %v1366_v19  ;;  %v3659_v18 = vld [vmem:[#allocation26_spill] sm:$0xff]  ;;  %v3669_v22 = vld [vmem:[#allocation20_spill] sm:$0xff] }
 0x16d   : > { %v1723_v25 = vadd.f32 %v1660_v42, %v1602_v45  ;;  %v1748_v38 = vadd.f32 %v3407_v7, %v1725_v46  ;;  %v3656_v45 = vld [vmem:[#allocation5_spill] sm:$0xff]  ;;  %v1492_v32 = vadd.f32 %v3659_v18, %v1371_v63  ;;  %v3666_v19 = vld [vmem:[#allocation18_spill] sm:$0xff]  ;;  %v3675_v36 = vld [vmem:[#allocation32_spill] sm:$0xff] }
 0x16e   : > { %v2622_v50 = vpop.f32.mrf.mxu0  ;;  %v1132_v46 = vadd.f32 %v3656_v45, %v3655_v53  ;;  %v1369_v42 = vadd.f32 %v3658_v60, %v1248_v56  ;;  %v1375_v56 = vadd.f32 %v3669_v22, %v1254_v55  ;;  %v3674_v45 = vld [vmem:[#allocation21_spill] sm:$0xff] }
 0x16f   : > { %v1726_v54 = vadd.f32 %v2622_v50, %v1605_v48  ;;  %v1746_v62 = vadd.f32 %v3407_v7, %v1723_v25  ;;  %v1764_v1 = vmax.f32 %v1748_v38, 0.0  ;;  %v1607_v48 = vadd.f32 %v3372_v37, %v1487_v2  ;;  %v3660_v50 = vld [vmem:[#allocation3_spill] sm:$0xff] }
 0x170   : > { %v1663_v26 = vpop.f32.mrf.mxu0  ;;  %v3662_v38 = vld [vmem:[#allocation11_spill] sm:$0xff]  ;;  %v1490_v57 = vadd.f32 %v3664_v21, %v1369_v42 }
 0x171   : > { %v1749_v8 = vadd.f32 %v3407_v7, %v1726_v54  ;;  %v1724_v17 = vadd.f32 %v1663_v26, %v1603_v35  ;;  %v1762_v9 = vmax.f32 %v1746_v62, 0.0  ;;  %v1135_v35 = vadd.f32 %v3661_v51, %v3660_v50  ;;  %v2615_v26 = vpop.f32.mrf.mxu1 }
 0x172   : > { %v2625_v31 = vpop.f32.mrf.mxu0  ;;  %v1249_v54 = vadd.f32 %v3662_v38, %v1129_v6  ;;  %v1612_v62 = vadd.f32 %v3384_v16, %v1492_v32  ;;  %v3667_v6 = vld [vmem:[#allocation29_spill] sm:$0xff]  ;;  %v1610_v43 = vadd.f32 %v3402_v23, %v1490_v57 }
 0x173   : > { %v1765_v34 = vmax.f32 %v1749_v8, 0.0  ;;  %v1747_v3 = vadd.f32 %v3407_v7, %v1724_v17  ;;  %v1729_v41 = vadd.f32 %v2625_v31, %v1608_v52  ;;  %v1493_v24 = vadd.f32 %v3667_v6, %v1372_v20  ;;  %v1587_v10 = vpop.f32.mrf.mxu1 }
 0x174   : > { %v1676_v15 = vpop.f32.mrf.mxu0  ;;  %v1370_v27 = vadd.f32 %v3666_v19, %v1249_v54 }
 0x175   : > { %v1779_v33 = vpack.c.bf16 %v1765_v34, %v1764_v1  ;;  %v1763_v12 = vmax.f32 %v1747_v3, 0.0  ;;  %v1727_v14 = vadd.f32 %v1676_v15, %v1606_v58  ;;  %v1752_v29 = vadd.f32 %v3407_v7, %v1729_v41  ;;  %v3668_v3 = vld [vmem:[#allocation15_spill] sm:$0xff]  ;;  %v2616_v50 = vpop.f32.mrf.mxu1 }
 0x176   : > { %v2626_v49 = vpop.f32.mrf.mxu0  ;;  %v1252_v41 = vadd.f32 %v3668_v3, %v1132_v46  ;;  %v1491_v59 = vadd.f32 %v3670_v13, %v1370_v27  ;;  %v1613_v63 = vadd.f32 %v2612_v28, %v1493_v24  ;;  %v1496_v46 = vadd.f32 %v3675_v36, %v1375_v56 }
 0x177   : > { %v1778_v25 = vpack.c.bf16 %v1763_v12, %v1762_v9  ;;  %v1730_v30 = vadd.f32 %v2626_v49, %v1609_v61  ;;  %v1750_v8 = vadd.f32 %v3407_v7, %v1727_v14  ;;  %v1768_v31 = vmax.f32 %v1752_v29, 0.0  ;;  %v3671_v9 = vld [vmem:[#allocation4_spill] sm:$0xff]  ;;  %v3673_v14 = vld [vmem:[#allocation17_spill] sm:$0xff]  ;;  %v3676_v49 = vld [vmem:[#allocation19_spill] sm:$0xff]  ;;  %v1590_v40 = vpop.f32.mrf.mxu1 }
 0x178   : > { %v1679_v52 = vpop.f32.mrf.mxu0  ;;  %v1255_v53 = vadd.f32 %v3673_v14, %v1135_v35  ;;  %v1373_v47 = vadd.f32 %v3674_v45, %v1252_v41  ;;  %v1611_v42 = vadd.f32 %v1574_v39, %v1491_v59  ;;  %v1616_v38 = vadd.f32 %v2615_v26, %v1496_v46  ;;  %v3678_v39 = vld [vmem:[#allocation23_spill] sm:$0xff] }
 0x179   : > { %v1753_v37 = vadd.f32 %v3407_v7, %v1730_v30  ;;  %v1728_v17 = vadd.f32 %v1679_v52, %v1607_v48  ;;  %2637 = vmatprep.mubr.msk.bf16.mxu1 %vm631_vm1, %v1778_v25  ;;  %v1766_v11 = vmax.f32 %v1750_v8, 0.0  ;;  %v3677_v25 = vld [vmem:[#allocation22_spill] sm:$0xff] }
 0x17a   : > { %v2629_v58 = vpop.f32.mrf.mxu0  ;;  %2638 = vmatmul.mubr.msk.bf16.vlgmr.msra.gmra.mxu1 %vm631_vm1, %v1779_v33  ;;  %v3672_v33 = vld [vmem:[#allocation7_spill] sm:$0xff]  ;;  %v1376_v29 = vadd.f32 %v3677_v25, %v1255_v53  ;;  %v1494_v30 = vadd.f32 %v3374_v4, %v1373_v47 }
 0x17b   : > { %v1769_v16 = vmax.f32 %v1753_v37, 0.0  ;;  %v1751_v1 = vadd.f32 %v3407_v7, %v1728_v17  ;;  %v1733_v34 = vadd.f32 %v2629_v58, %v1612_v62  ;;  %v1133_v12 = vadd.f32 %v3672_v33, %v3671_v9 }
 0x17c   : > { %v1692_v2 = vpop.f32.mrf.mxu0  ;;  %v1497_v21 = vadd.f32 %v3378_v5, %v1376_v29  ;;  %v1614_v57 = vadd.f32 %v1587_v10, %v1494_v30 }
 0x17d   : > { %v1781_v61 = vpack.c.bf16 %v1769_v16, %v1768_v31  ;;  %v1767_v23 = vmax.f32 %v1751_v1, 0.0  ;;  %v1731_v15 = vadd.f32 %v1692_v2, %v1610_v43  ;;  %v1756_v28 = vadd.f32 %v3407_v7, %v1733_v34  ;;  %v3486_v2 = vld [vmem:[%s3611_s6] ss:$0 sm:$0xff] }
 0x17e   : > { %v2630_v60 = vpop.f32.mrf.mxu0  ;;  %v1253_v48 = vadd.f32 %v3676_v49, %v1133_v12  ;;  %v1617_v17 = vadd.f32 %v2616_v50, %v1497_v21 }
 0x17f   : > { %v1780_v18 = vpack.c.bf16 %v1767_v23, %v1766_v11  ;;  %v1734_v32 = vadd.f32 %v2630_v60, %v1613_v63  ;;  %v1754_v35 = vadd.f32 %v3407_v7, %v1731_v15  ;;  %v1772_v62 = vmax.f32 %v1756_v28, 0.0 }
 0x180   : > { %v1695_v51 = vpop.f32.mrf.mxu0  ;;  %v1374_v20 = vadd.f32 %v3678_v39, %v1253_v48 }
 0x181   : > { %v1757_v54 = vadd.f32 %v3407_v7, %v1734_v32  ;;  %v1732_v0 = vadd.f32 %v1695_v51, %v1611_v42  ;;  %2641 = vmatprep.mubr.msk.bf16.mxu1 %vm631_vm1, %v1780_v18  ;;  %v1770_v19 = vmax.f32 %v1754_v35, 0.0 }
 0x182   : > { %v2633_v52 = vpop.f32.mrf.mxu0  ;;  %2642 = vmatmul.mubr.msk.bf16.gmra.mxu1 %vm631_vm1, %v1781_v61  ;;  %v1495_v37 = vadd.f32 %v3386_v44, %v1374_v20 }
 0x183   : > { %v1773_v4 = vmax.f32 %v1757_v54, 0.0  ;;  %v1755_v8 = vadd.f32 %v3407_v7, %v1732_v0  ;;  %v1737_v26 = vadd.f32 %v2633_v52, %v1616_v38 }
 0x184   : > { %v1708_v55 = vpop.f32.mrf.mxu0  ;;  %v1615_v5 = vadd.f32 %v1590_v40, %v1495_v37 }
 0x185   : > { %v1783_v27 = vpack.c.bf16 %v1773_v4, %v1772_v62  ;;  %v1771_v6 = vmax.f32 %v1755_v8, 0.0  ;;  %v1735_v24 = vadd.f32 %v1708_v55, %v1614_v57  ;;  %v1760_v31 = vadd.f32 %v3407_v7, %v1737_v26 }
 0x186   : > { %v2634_v43 = vpop.f32.mrf.mxu0 }
 0x187   : > { %v1782_v58 = vpack.c.bf16 %v1771_v6, %v1770_v19  ;;  %v1738_v16 = vadd.f32 %v2634_v43, %v1617_v17  ;;  %v1758_v34 = vadd.f32 %v3407_v7, %v1735_v24  ;;  %v1776_v41 = vmax.f32 %v1760_v31, 0.0 }
 0x188   : > { %v1711_v1 = vpop.f32.mrf.mxu0 }
 0x189   : > { %v1761_v3 = vadd.f32 %v3407_v7, %v1738_v16  ;;  %v1736_v44 = vadd.f32 %v1711_v1, %v1615_v5  ;;  %2645 = vmatprep.mubr.msk.bf16.mxu1 %vm631_vm1, %v1782_v58  ;;  %v1774_v13 = vmax.f32 %v1758_v34, 0.0 }
 0x18a   : > { %2646 = vmatmul.mubr.msk.bf16.gmra.mxu1 %vm631_vm1, %v1783_v27 }
 0x18b   : > { %v1777_v22 = vmax.f32 %v1761_v3, 0.0  ;;  %v1759_v56 = vadd.f32 %v3407_v7, %v1736_v44 }
 0x18d   : > { %v1785_v59 = vpack.c.bf16 %v1777_v22, %v1776_v41  ;;  %v1775_v63 = vmax.f32 %v1759_v56, 0.0 }
 0x18f   : > { %v1784_v10 = vpack.c.bf16 %v1775_v63, %v1774_v13 }
 0x191   : > { %2649 = vmatprep.mubr.msk.bf16.mxu1 %vm631_vm1, %v1784_v10 }
 0x192   : > { %2650 = vmatmul.mubr.msk.bf16.gmra.mxu1 %vm631_vm1, %v1785_v59 }
 0x23a   : > { %v2639_v11 = vpop.f32.mrf.mxu1 }
 0x23b   : > { %v1864_v61 = vadd.f32 %v2639_v11, %v3486_v2 }
 0x23c   : > { %v1855_v7 = vpop.f32.mrf.mxu1 }
 0x23d   : > { %v2369_v23 = vpack.c.bf16 %v1864_v61, %v1864_v61  ;;  %v1856_v15 = vadd.f32 %v3486_v2, %v1855_v7 }
 0x23e   : > { %v2640_v9 = vpop.f32.mrf.mxu1 }
 0x23f   : > { %1985 = vst.msk [vmem:[%s3493_s21 + $0x10] sm:$0xf] %vm1982_vm8, %v2369_v23  ;;  %v2367_v33 = vpack.c.bf16 %v1856_v15, %v1856_v15  ;;  %v1867_v12 = vadd.f32 %v2640_v9, %v3486_v2  ;;  %2003 = vrot.lane.b32.xlu1 %v2369_v23, %s2756_s20 }
 0x240   : > { %v1858_v14 = vpop.f32.mrf.mxu1 }
 0x241   : > { %1983 = vst.msk [vmem:[%s3493_s21] sm:$0xf] %vm1982_vm8, %v2367_v33  ;;  %v2370_v53 = vpack.c.bf16 %v1867_v12, %v1867_v12  ;;  %v1859_v45 = vadd.f32 %v3486_v2, %v1858_v14  ;;  %1999 = vrot.lane.b32.xlu0 %v2367_v33, %s2756_s20 }
 0x242   : > { %v2643_v47 = vpop.f32.mrf.mxu1 }
 0x243   : > { %1986 = vst.msk [vmem:[%s3493_s21 + $0x14] sm:$0xf] %vm1982_vm8, %v2370_v53  ;;  %v2368_v36 = vpack.c.bf16 %v1859_v45, %v1859_v45  ;;  %v1880_v46 = vadd.f32 %v2643_v47, %v3486_v2  ;;  %2005 = vrot.lane.b32.xlu1 %v2370_v53, %s2756_s20 }
 0x244   : > { %v1871_v60 = vpop.f32.mrf.mxu1 }
 0x245   : > { %1984 = vst.msk [vmem:[%s3493_s21 + $0x4] sm:$0xf] %vm1982_vm8, %v2368_v36  ;;  %v2373_v42 = vpack.c.bf16 %v1880_v46, %v1880_v46  ;;  %v1872_v18 = vadd.f32 %v3486_v2, %v1871_v60  ;;  %2001 = vrot.lane.b32.xlu0 %v2368_v36, %s2756_s20 }
 0x246   : > { %v2644_v28 = vpop.f32.mrf.mxu1 }
 0x247   : > { %1989 = vst.msk [vmem:[%s3493_s21 + $0x30] sm:$0xf] %vm1982_vm8, %v2373_v42  ;;  %v2371_v32 = vpack.c.bf16 %v1872_v18, %v1872_v18  ;;  %v1883_v49 = vadd.f32 %v2644_v28, %v3486_v2 }
 0x248   : > { %v1874_v48 = vpop.f32.mrf.mxu1 }
 0x249   : > { %1987 = vst.msk [vmem:[%s3493_s21 + $0x20] sm:$0xf] %vm1982_vm8, %v2371_v32  ;;  %v2374_v25 = vpack.c.bf16 %v1883_v49, %v1883_v49  ;;  %v1875_v29 = vadd.f32 %v3486_v2, %v1874_v48  ;;  %2011 = vrot.lane.b32.xlu0 %v2373_v42, %s2756_s20 }
 0x24a   : > { %v2647_v30 = vpop.f32.mrf.mxu1 }
 0x24b   : > { %1990 = vst.msk [vmem:[%s3493_s21 + $0x34] sm:$0xf] %vm1982_vm8, %v2374_v25  ;;  %v2372_v50 = vpack.c.bf16 %v1875_v29, %v1875_v29  ;;  %v1896_v51 = vadd.f32 %v2647_v30, %v3486_v2  ;;  %2013 = vrot.lane.b32.xlu1 %v2374_v25, %s2756_s20 }
 0x24c   : > { %v1887_v38 = vpop.f32.mrf.mxu1 }
 0x24d   : > { %1988 = vst.msk [vmem:[%s3493_s21 + $0x24] sm:$0xf] %vm1982_vm8, %v2372_v50  ;;  %v2377_v35 = vpack.c.bf16 %v1896_v51, %v1896_v51  ;;  %v1888_v54 = vadd.f32 %v3486_v2, %v1887_v38  ;;  %2007 = vrot.lane.b32.xlu0 %v2371_v32, %s2756_s20 }
 0x24e   : > { %v2648_v0 = vpop.f32.mrf.mxu1 }
 0x24f   : > { %1993 = vst.msk [vmem:[%s3493_s21 + $0x50] sm:$0xf] %vm1982_vm8, %v2377_v35  ;;  %v2375_v39 = vpack.c.bf16 %v1888_v54, %v1888_v54  ;;  %v1899_v20 = vadd.f32 %v2648_v0, %v3486_v2  ;;  %2009 = vrot.lane.b32.xlu1 %v2372_v50, %s2756_s20 }
 0x250   : > { %v1890_v21 = vpop.f32.mrf.mxu1 }
 0x251   : > { %1991 = vst.msk [vmem:[%s3493_s21 + $0x40] sm:$0xf] %vm1982_vm8, %v2375_v39  ;;  %v2378_v57 = vpack.c.bf16 %v1899_v20, %v1899_v20  ;;  %v1891_v52 = vadd.f32 %v3486_v2, %v1890_v21  ;;  %2019 = vrot.lane.b32.xlu0 %v2377_v35, %s2756_s20 }
 0x252   : > { %v2651_v62 = vpop.f32.mrf.mxu1 }
 0x253   : > { %1994 = vst.msk [vmem:[%s3493_s21 + $0x54] sm:$0xf] %vm1982_vm8, %v2378_v57  ;;  %v2376_v4 = vpack.c.bf16 %v1891_v52, %v1891_v52  ;;  %v1912_v8 = vadd.f32 %v2651_v62, %v3486_v2  ;;  %2021 = vrot.lane.b32.xlu1 %v2378_v57, %s2756_s20 }
 0x254   : > { %v1903_v26 = vpop.f32.mrf.mxu1 }
 0x255   : > { %1992 = vst.msk [vmem:[%s3493_s21 + $0x44] sm:$0xf] %vm1982_vm8, %v2376_v4  ;;  %v2381_v37 = vpack.c.bf16 %v1912_v8, %v1912_v8  ;;  %v1904_v17 = vadd.f32 %v3486_v2, %v1903_v26  ;;  %2015 = vrot.lane.b32.xlu0 %v2375_v39, %s2756_s20 }
 0x256   : > { %v2652_v40 = vpop.f32.mrf.mxu1 }
 0x257   : > { %1997 = vst.msk [vmem:[%s3493_s21 + $0x70] sm:$0xf] %vm1982_vm8, %v2381_v37  ;;  %v2379_v55 = vpack.c.bf16 %v1904_v17, %v1904_v17  ;;  %v1915_v19 = vadd.f32 %v2652_v40, %v3486_v2  ;;  %2017 = vrot.lane.b32.xlu1 %v2376_v4, %s2756_s20 }
 0x258   : > { %v1906_v27 = vpop.f32.mrf.mxu1 }
 0x259   : > { %1995 = vst.msk [vmem:[%s3493_s21 + $0x60] sm:$0xf] %vm1982_vm8, %v2379_v55  ;;  %v2382_v6 = vpack.c.bf16 %v1915_v19, %v1915_v19  ;;  %v1907_v24 = vadd.f32 %v3486_v2, %v1906_v27  ;;  %2023 = vrot.lane.b32.xlu0 %v2379_v55, %s2756_s20 }
 0x25b   : > { %1998 = vst.msk [vmem:[%s3493_s21 + $0x74] sm:$0xf] %vm1982_vm8, %v2382_v6  ;;  %v2380_v43 = vpack.c.bf16 %v1907_v24, %v1907_v24 }
 0x25d   : > { %1996 = vst.msk [vmem:[%s3493_s21 + $0x64] sm:$0xf] %vm1982_vm8, %v2380_v43  ;;  %2025 = vrot.lane.b32.xlu1 %v2380_v43, %s2756_s20  ;;  %2027 = vrot.lane.b32.xlu0 %v2381_v37, %s2756_s20 }
 0x261   : > { %2029 = vrot.lane.b32.xlu1 %v2382_v6, %s2756_s20 }
 0x2b1   : > { %v2004_v5 = vpop.permute.xlu1 %2003 }
 0x2b2   : > { %2349 = vst.msk [vmem:[%s3493_s21 + $0x18] sm:$0xf] %vm1982_vm8, %v2004_v5 }
 0x2b3   : > { %v2000_v58 = vpop.permute.xlu0 %1999 }
 0x2b4   : > { %2347 = vst.msk [vmem:[%s3493_s21 + $0x8] sm:$0xf] %vm1982_vm8, %v2000_v58 }
 0x2b5   : > { %v2006_v31 = vpop.permute.xlu1 %2005 }
 0x2b6   : > { %2350 = vst.msk [vmem:[%s3493_s21 + $0x1c] sm:$0xf] %vm1982_vm8, %v2006_v31 }
 0x2b7   : > { %v2002_v16 = vpop.permute.xlu0 %2001 }
 0x2b8   : > { %2348 = vst.msk [vmem:[%s3493_s21 + $0xc] sm:$0xf] %vm1982_vm8, %v2002_v16 }
 0x2bb   : > { %v2012_v1 = vpop.permute.xlu0 %2011 }
 0x2bc   : > { %2353 = vst.msk [vmem:[%s3493_s21 + $0x38] sm:$0xf] %vm1982_vm8, %v2012_v1 }
 0x2bd   : > { %v2014_v34 = vpop.permute.xlu1 %2013 }
 0x2be   : > { %2354 = vst.msk [vmem:[%s3493_s21 + $0x3c] sm:$0xf] %vm1982_vm8, %v2014_v34 }
 0x2bf   : > { %v2008_v3 = vpop.permute.xlu0 %2007 }
 0x2c0   : > { %2351 = vst.msk [vmem:[%s3493_s21 + $0x28] sm:$0xf] %vm1982_vm8, %v2008_v3 }
 0x2c1   : > { %v2010_v44 = vpop.permute.xlu1 %2009 }
 0x2c2   : > { %2352 = vst.msk [vmem:[%s3493_s21 + $0x2c] sm:$0xf] %vm1982_vm8, %v2010_v44 }
 0x2c3   : > { %v2020_v41 = vpop.permute.xlu0 %2019 }
 0x2c4   : > { %2357 = vst.msk [vmem:[%s3493_s21 + $0x58] sm:$0xf] %vm1982_vm8, %v2020_v41 }
 0x2c5   : > { %v2022_v22 = vpop.permute.xlu1 %2021 }
 0x2c6   : > { %2358 = vst.msk [vmem:[%s3493_s21 + $0x5c] sm:$0xf] %vm1982_vm8, %v2022_v22 }
 0x2c7   : > { %v2016_v56 = vpop.permute.xlu0 %2015 }
 0x2c8   : > { %2355 = vst.msk [vmem:[%s3493_s21 + $0x48] sm:$0xf] %vm1982_vm8, %v2016_v56 }
 0x2c9   : > { %v2018_v13 = vpop.permute.xlu1 %2017 }
 0x2ca   : > { %2356 = vst.msk [vmem:[%s3493_s21 + $0x4c] sm:$0xf] %vm1982_vm8, %v2018_v13 }
 0x2cb   : > { %v2024_v59 = vpop.permute.xlu0 %2023 }
 0x2cc   : > { %2359 = vst.msk [vmem:[%s3493_s21 + $0x68] sm:$0xf] %vm1982_vm8, %v2024_v59 }
 0x2cf   : > { %v2026_v63 = vpop.permute.xlu1 %2025  ;;  %v2028_v10 = vpop.permute.xlu0 %2027 }
 0x2d0   : > { %2360 = vst.msk [vmem:[%s3493_s21 + $0x6c] sm:$0xf] %vm1982_vm8, %v2026_v63  ;;  %2361 = vst.msk [vmem:[%s3493_s21 + $0x78] sm:$0xf] %vm1982_vm8, %v2028_v10 }
 0x2d3   : > { %v2030_v2 = vpop.permute.xlu1 %2029 }
 0x2d4   : > { %2362 = vst.msk [vmem:[%s3493_s21 + $0x7c] sm:$0xf] %vm1982_vm8, %v2030_v2 }
 0x2d5 PF: > { %s17_s28 = sadd.s32 1, %s2754_s28   ;;  %s3679_s24 = smov %s2746_s26 }
 0x2d6   : > { %p14_p0 = scmp.ge.s32.totalorder %s17_s28, 6   ;;  %s3680_s25 = smov %s2750_s27 }
 0x2d7   : > { %s3681_s26 = smov %s3684_s29  ;;  %s3682_s27 = smov %s3688_s30 }
 0x2d8   :  { %16 = sbr.rel (!%p14_p0) target bundleno = 3 (0x3), region = 93 }

</bundles_post_ra>
